<compile_context>
chip_gen: v7x
topology: tpu7x:2x2x1
jax: 0.10.0
libtpu: 0.0.40
codegen_flags: <defaults>
</compile_context>

<pallas_src>
import functools
import math

import jax
import jax.numpy as jnp
from jax.experimental import pallas as pl
from jax.experimental.pallas import tpu as pltpu

_INV_SQRT2 = 1.0 / math.sqrt(2.0)
_MIB = 1024 * 1024


# ----------------------------------------------------------------------------- hw / tiling helpers
def _round_up(x, m):
    return ((x + m - 1) // m) * m


def _vmem_capacity_bytes():
    # Generation-aware VMEM capacity (v5e/v6e: 128 MiB, v7x: 64 MiB per TC).
    # Conservative 64 MiB fallback if the query is unavailable.
    try:
        return int(pltpu.get_tpu_info().vmem_capacity_bytes)
    except Exception:
        return 64 * _MIB


def _vmem_limit(est_bytes, cap):
    # Scoped-VMEM budget: ~1.4x the (fully counted) working set, capped at 85%
    # of physical VMEM so Mosaic keeps internal-scratch headroom (v7x safety).
    hi = int(0.85 * cap)
    return int(min(max(int(1.4 * est_bytes), 32 * _MIB), hi))


def _pick_tm(m, pref):
    """Row tile: a multiple of 8 that divides round_up(m, 8) (so padding/slicing
    are no-ops beyond <=7 alignment rows) and, when possible, yields >=2 grid
    steps so both v7x TensorCores get work."""
    m8 = _round_up(m, 8)
    cap = min(pref, m8)
    if m8 >= 16:
        cap = min(cap, max(m8 // 2, 8))
    cap = max(cap, 8)
    best = 8
    t = 8
    while t <= cap:
        if m8 % t == 0:
            best = t
        t += 8
    return best


def _pad_rows(x, m_pad):
    m = x.shape[0]
    return x if m == m_pad else jnp.pad(x, ((0, m_pad - m), (0, 0)))


def _const_spec(shape, index_map):
    """BlockSpec for grid-invariant operands: single-buffered (Buffered(1)) so
    resident weights are not pointlessly double-buffered."""
    try:
        return pl.BlockSpec(shape, index_map, pipeline_mode=pl.Buffered(1))
    except TypeError:  # older jax without pipeline_mode kwarg
        return pl.BlockSpec(shape, index_map)


def _preferred_tm(hidden, inter, w_bytes, x_bytes, cap):
    """Largest power-of-two row tile (<=1024) whose fused-FFN working set fits
    in ~80% of this generation's VMEM."""
    resident = 2 * hidden * inter * w_bytes + (inter + 3 * hidden) * w_bytes
    per_row = (4 * hidden * x_bytes          # x in + out, double-buffered
               + inter * (4 + w_bytes)       # f32 GELU intermediate + matmul copy
               + 2 * hidden * 4)             # f32 z + epilogue temporaries
    budget = int(0.80 * cap) - resident
    tm = 1024
    while tm > 64 and tm * per_row > budget:
        tm //= 2
    return tm


def _layer_norm_f32(z, gamma, beta, eps):
    # z is f32; matches torch.nn.LayerNorm (biased variance).
    mu = jnp.mean(z, axis=-1, keepdims=True)
    c = z - mu
    var = jnp.mean(c * c, axis=-1, keepdims=True)
    return c * jax.lax.rsqrt(var + eps) * gamma.astype(jnp.float32) + beta.astype(jnp.float32)


# ----------------------------------------------------------------------------- kernel 1: linear + bias
def _linear_kernel(x_ref, w_ref, b_ref, o_ref):
    z = jnp.dot(x_ref[...], w_ref[...], preferred_element_type=jnp.float32)
    o_ref[...] = (z + b_ref[...].astype(jnp.float32)).astype(o_ref.dtype)


def linear(x, w, b, *, tm_pref, cap):
    """x: [M, K]; w: [K, N] (pre-transposed); b: [N] -> [M, N]."""
    m, k = x.shape
    n = w.shape[1]
    tm = _pick_tm(m, tm_pref)
    m_pad = _round_up(m, tm)
    xp = _pad_rows(x, m_pad)
    xb, wb = x.dtype.itemsize, w.dtype.itemsize
    est = 2 * tm * k * xb + (k + 1) * n * wb + 2 * tm * n * xb + tm * n * 4
    out = pl.pallas_call(
        _linear_kernel,
        out_shape=jax.ShapeDtypeStruct((m_pad, n), x.dtype),
        grid_spec=pltpu.PrefetchScalarGridSpec(
            num_scalar_prefetch=0,
            grid=(m_pad // tm,),
            in_specs=[
                pl.BlockSpec((tm, k), lambda i: (i, 0)),
                _const_spec((k, n), lambda i: (0, 0)),
                _const_spec((1, n), lambda i: (0, 0)),
            ],
            out_specs=pl.BlockSpec((tm, n), lambda i: (i, 0)),
        ),
        compiler_params=pltpu.CompilerParams(
            dimension_semantics=("parallel",),
            vmem_limit_bytes=_vmem_limit(est, cap),
        ),
    )(xp, w, b.reshape(1, n))
    return out[:m] if m_pad != m else out


# ----------------------------------------------------------------------------- kernel 2: attention (all heads of one batch row per step)
def _mha_kernel(qkv_ref, m_ref, o_ref, *, num_heads, head_dim, hidden, scale):
    qkv = qkv_ref[0, :, :]                                    # (S, 3H), one batch row
    add_mask = m_ref[0, :, :].astype(jnp.float32)             # (1, S): broadcast over queries
    # Fold 1/sqrt(d) into q once (S*H muls) instead of scaling every SxS score tile.
    q = (qkv[:, 0:hidden].astype(jnp.float32) * scale).astype(qkv.dtype)
    k = qkv[:, hidden:2 * hidden]
    v = qkv[:, 2 * hidden:]
    # TODO(synk): for S >~ 1024 switch to a KV-tiled online-softmax inner loop so
    # the SxS f32 scores never exceed v7x's 64 MiB VMEM.
    ctx = []
    for h in range(num_heads):                                # unrolled: all heads, one grid step
        sl = slice(h * head_dim, (h + 1) * head_dim)
        s = jax.lax.dot_general(q[:, sl], k[:, sl], (((1,), (1,)), ((), ())),
                                preferred_element_type=jnp.float32)
        s = s + add_mask
        s = s - jnp.max(s, axis=-1, keepdims=True)
        p = jnp.exp(s)
        inv = pl.reciprocal(jnp.sum(p, axis=-1, keepdims=True), approx=False)
        c = jnp.dot(p.astype(v.dtype), v[:, sl], preferred_element_type=jnp.float32)
        ctx.append(c * inv)                                   # deferred softmax normalization
    o_ref[0, :, :] = jnp.concatenate(ctx, axis=-1).astype(o_ref.dtype)


def attention(qkv, mask_b1s, *, num_heads, cap):
    """qkv: [B, S, 3H] (head-major q|k|v columns); mask: [B, 1, S] additive.
    Returns ctx [B, S, H] already in (B, S, nH*d) layout -> no HBM transposes."""
    B, S, H3 = qkv.shape
    H = H3 // 3
    d = H // num_heads
    xb = qkv.dtype.itemsize
    kern = functools.partial(_mha_kernel, num_heads=num_heads, head_dim=d,
                             hidden=H, scale=1.0 / math.sqrt(d))
    est = (2 * S * H3 * xb + 2 * S * H * xb     # qkv in + ctx out (double-buffered)
           + S * H * 4                           # scaled-q copy
           + S * S * (4 + xb)                    # f32 scores + cast for p @ v
           + S * H * 4 + S * xb)                 # concatenated f32 ctx + mask
    return pl.pallas_call(
        kern,
        out_shape=jax.ShapeDtypeStruct((B, S, H), qkv.dtype),
        grid_spec=pltpu.PrefetchScalarGridSpec(
            num_scalar_prefetch=0,
            grid=(B,),
            in_specs=[
                pl.BlockSpec((1, S, H3), lambda b: (b, 0, 0)),
                pl.BlockSpec((1, 1, S), lambda b: (b, 0, 0)),
            ],
            out_specs=pl.BlockSpec((1, S, H), lambda b: (b, 0, 0)),
        ),
        compiler_params=pltpu.CompilerParams(
            dimension_semantics=("parallel",),
            vmem_limit_bytes=_vmem_limit(est, cap),
        ),
    )(qkv, mask_b1s)


# ----------------------------------------------------------------------------- kernel 3: dense + residual + LayerNorm
def _linear_res_ln_kernel(x_ref, r_ref, w_ref, b_ref, g_ref, bt_ref, o_ref, *, eps):
    z = jnp.dot(x_ref[...], w_ref[...], preferred_element_type=jnp.float32)
    z = z + b_ref[...].astype(jnp.float32) + r_ref[...].astype(jnp.float32)
    o_ref[...] = _layer_norm_f32(z, g_ref[...], bt_ref[...], eps).astype(o_ref.dtype)


def linear_residual_layernorm(x, w, b, residual, gamma, beta, *, eps, tm_pref, cap):
    m, k = x.shape
    n = w.shape[1]
    tm = _pick_tm(m, tm_pref)
    m_pad = _round_up(m, tm)
    xp, rp = _pad_rows(x, m_pad), _pad_rows(residual, m_pad)
    xb, wb = x.dtype.itemsize, w.dtype.itemsize
    est = (2 * tm * k * xb + 4 * tm * n * xb + (k + 3) * n * wb + 2 * tm * n * 4)
    kern = functools.partial(_linear_res_ln_kernel, eps=eps)
    out = pl.pallas_call(
        kern,
        out_shape=jax.ShapeDtypeStruct((m_pad, n), x.dtype),
        grid_spec=pltpu.PrefetchScalarGridSpec(
            num_scalar_prefetch=0,
            grid=(m_pad // tm,),
            in_specs=[
                pl.BlockSpec((tm, k), lambda i: (i, 0)),
                pl.BlockSpec((tm, n), lambda i: (i, 0)),
                _const_spec((k, n), lambda i: (0, 0)),
                _const_spec((1, n), lambda i: (0, 0)),
                _const_spec((1, n), lambda i: (0, 0)),
                _const_spec((1, n), lambda i: (0, 0)),
            ],
            out_specs=pl.BlockSpec((tm, n), lambda i: (i, 0)),
        ),
        compiler_params=pltpu.CompilerParams(
            dimension_semantics=("parallel",),
            vmem_limit_bytes=_vmem_limit(est, cap),
        ),
    )(xp, rp, w, b.reshape(1, n), gamma.reshape(1, n), beta.reshape(1, n))
    return out[:m] if m_pad != m else out


# ----------------------------------------------------------------------------- kernel 4: fused FFN (GELU stays in VMEM)
def _ffn_kernel(x_ref, w1_ref, b1_ref, w2_ref, b2_ref, g_ref, bt_ref, o_ref, *, eps):
    x = x_ref[...]
    h = jnp.dot(x, w1_ref[...], preferred_element_type=jnp.float32)
    h = h + b1_ref[...].astype(jnp.float32)
    h = 0.5 * h * (1.0 + jax.lax.erf(h * _INV_SQRT2))         # exact GELU (nn.GELU default)
    z = jnp.dot(h.astype(w2_ref.dtype), w2_ref[...], preferred_element_type=jnp.float32)
    z = z + b2_ref[...].astype(jnp.float32) + x.astype(jnp.float32)
    o_ref[...] = _layer_norm_f32(z, g_ref[...], bt_ref[...], eps).astype(o_ref.dtype)


def ffn_fused(x, w1, b1, w2, b2, gamma, beta, *, eps, tm_pref, cap):
    """LayerNorm(GELU(x @ w1 + b1) @ w2 + b2 + x); the [tm, I] GELU never hits HBM."""
    m, h = x.shape
    i_dim = w1.shape[1]
    tm = _pick_tm(m, tm_pref)
    m_pad = _round_up(m, tm)
    xp = _pad_rows(x, m_pad)
    xb, wb = x.dtype.itemsize, w1.dtype.itemsize
    est = (4 * tm * h * xb + 2 * h * i_dim * wb + (i_dim + 3 * h) * wb
           + tm * i_dim * (4 + wb) + 2 * tm * h * 4)
    kern = functools.partial(_ffn_kernel, eps=eps)
    out = pl.pallas_call(
        kern,
        out_shape=jax.ShapeDtypeStruct((m_pad, h), x.dtype),
        grid_spec=pltpu.PrefetchScalarGridSpec(
            num_scalar_prefetch=0,
            grid=(m_pad // tm,),
            in_specs=[
                pl.BlockSpec((tm, h), lambda i: (i, 0)),
                _const_spec((h, i_dim), lambda i: (0, 0)),
                _const_spec((1, i_dim), lambda i: (0, 0)),
                _const_spec((i_dim, h), lambda i: (0, 0)),
                _const_spec((1, h), lambda i: (0, 0)),
                _const_spec((1, h), lambda i: (0, 0)),
                _const_spec((1, h), lambda i: (0, 0)),
            ],
            out_specs=pl.BlockSpec((tm, h), lambda i: (i, 0)),
        ),
        compiler_params=pltpu.CompilerParams(
            dimension_semantics=("parallel",),
            vmem_limit_bytes=_vmem_limit(est, cap),
        ),
    )(xp, w1, b1.reshape(1, i_dim), w2, b2.reshape(1, h),
      gamma.reshape(1, h), beta.reshape(1, h))
    return out[:m] if m_pad != m else out


# ----------------------------------------------------------------------------- encoder wrapper
def bert_layer(x, mask_b1s, lp, *, num_heads, eps, tm_pref, cap):
    B, S, H = x.shape
    M = B * S
    x2 = x.reshape(M, H)

    # 1) fused QKV projection (one matmul); columns stay head-major so the
    #    attention kernel slices heads in VMEM (no HBM split / transposes).
    qkv = linear(x2, lp["wqkv"], lp["bqkv"], tm_pref=tm_pref, cap=cap)      # [M, 3H]

    # 2) attention: ctx comes back already in (B, S, nH*d) layout.
    ctx = attention(qkv.reshape(B, S, 3 * H), mask_b1s, num_heads=num_heads, cap=cap)
    ctx2 = ctx.reshape(M, H)                                                # free reshape

    # TODO(synk): training-mode dropout (attention-probs / hidden dropout) not
    # implemented; matches the module in eval mode (dropout = identity).
    attn_out = linear_residual_layernorm(
        ctx2, lp["wo"], lp["bo"], x2, lp["ln1_g"], lp["ln1_b"],
        eps=eps, tm_pref=tm_pref, cap=cap)

    y = ffn_fused(attn_out, lp["w1"], lp["b1"], lp["w2"], lp["b2"],
                  lp["ln2_g"], lp["ln2_b"], eps=eps, tm_pref=tm_pref, cap=cap)
    return y.reshape(B, S, H)


def bert_encoder(hidden_states, attention_mask_b1s, params, *, num_heads, eps):
    B, S, H = hidden_states.shape
    cap = _vmem_capacity_bytes()
    tm_pref = _preferred_tm(H, params[0]["w1"].shape[1],
                            params[0]["w1"].dtype.itemsize,
                            hidden_states.dtype.itemsize, cap)
    x = hidden_states
    for lp in params:
        x = bert_layer(x, attention_mask_b1s, lp, num_heads=num_heads, eps=eps,
                       tm_pref=tm_pref, cap=cap)
    return x


# ----------------------------------------------------------------------------- params (pre-transposed, QKV concat)
def init_params(key, num_layers, hidden, inter, dtype=jnp.float32):
    params = []
    for _ in range(num_layers):
        keys = jax.random.split(key, 13)
        key = keys[0]

        def lin(kw, kb, fan_in, fan_out):
            bound = 1.0 / math.sqrt(fan_in)
            w = jax.random.uniform(kw, (fan_in, fan_out), dtype, -bound, bound)  # [in, out]
            b = jax.random.uniform(kb, (fan_out,), dtype, -bound, bound)
            return w, b

        wq, bq = lin(keys[1], keys[2], hidden, hidden)
        wk, bk = lin(keys[3], keys[4], hidden, hidden)
        wv, bv = lin(keys[5], keys[6], hidden, hidden)
        wo, bo = lin(keys[7], keys[8], hidden, hidden)
        w1, b1 = lin(keys[9], keys[10], hidden, inter)
        w2, b2 = lin(keys[11], keys[12], inter, hidden)
        params.append(dict(
            wqkv=jnp.concatenate([wq, wk, wv], axis=1),   # transpose/concat hoisted to init
            bqkv=jnp.concatenate([bq, bk, bv], axis=0),
            wo=wo, bo=bo, w1=w1, b1=b1, w2=w2, b2=b2,
            ln1_g=jnp.ones((hidden,), dtype), ln1_b=jnp.zeros((hidden,), dtype),
            ln2_g=jnp.ones((hidden,), dtype), ln2_b=jnp.zeros((hidden,), dtype),
        ))
    return params


# ----------------------------------------------------------------------------- pure-JAX reference
def _ln_ref(z, g, b, eps):
    mu = jnp.mean(z, axis=-1, keepdims=True)
    c = z - mu
    var = jnp.mean(c * c, axis=-1, keepdims=True)
    return c * jax.lax.rsqrt(var + eps) * g + b


def ref_encoder(x, mask_b11s, params, *, num_heads, eps):
    B, S, H = x.shape
    d = H // num_heads
    for lp in params:
        qkv = x @ lp["wqkv"] + lp["bqkv"]
        q, k, v = jnp.split(qkv, 3, axis=-1)

        def heads(t):
            return t.reshape(B, S, num_heads, d).transpose(0, 2, 1, 3)

        qh, kh, vh = heads(q), heads(k), heads(v)
        s = jnp.einsum("bhqd,bhkd->bhqk", qh, kh) / math.sqrt(d) + mask_b11s
        p = jax.nn.softmax(s, axis=-1)
        ctx = jnp.einsum("bhqk,bhkd->bhqd", p, vh)
        ctx = ctx.transpose(0, 2, 1, 3).reshape(B, S, H)
        a = _ln_ref(ctx @ lp["wo"] + lp["bo"] + x, lp["ln1_g"], lp["ln1_b"], eps)
        h = a @ lp["w1"] + lp["b1"]
        h = 0.5 * h * (1.0 + jax.lax.erf(h * _INV_SQRT2))
        x = _ln_ref(h @ lp["w2"] + lp["b2"] + a, lp["ln2_g"], lp["ln2_b"], eps)
    return x


# ----------------------------------------------------------------------------- demo / self-check
if __name__ == "__main__":
    batch, seq, hidden, heads, inter, layers = 2, 128, 256, 4, 512, 2
    eps = 1e-12

    key = jax.random.PRNGKey(0)
    k_p, k_x = jax.random.split(key, 2)
    params = init_params(k_p, layers, hidden, inter, jnp.float32)
    hidden_states = jax.random.normal(k_x, (batch, seq, hidden), jnp.float32)

    # Additive attention mask (0 = keep, -1e9 = masked); mask out the last 16
    # key positions of batch 1, like a HF-style [B, 1, 1, S] extended mask.
    keep = jnp.ones((batch, seq), jnp.float32).at[1, -16:].set(0.0)
    add_mask = (1.0 - keep) * -1e9

    out = bert_encoder(hidden_states, add_mask.reshape(batch, 1, seq), params,
                       num_heads=heads, eps=eps)
    out = jax.block_until_ready(out)

    ref = ref_encoder(hidden_states, add_mask.reshape(batch, 1, 1, seq), params,
                      num_heads=heads, eps=eps)
    ref = jax.block_until_ready(ref)

    assert out.shape == (batch, seq, hidden)
    # Tolerance allows for default-precision (bf16-pass) MXU matmuls on either
    # path; structural errors (wrong head columns / mask / residual) are O(1).
    err = float(jnp.max(jnp.abs(out - ref)))
    assert jnp.allclose(out, ref, atol=3e-2, rtol=3e-2), f"max abs err = {err}"

    # bf16 weights/activations (the biggest throughput lever from the review):
    # same kernels, f32 accumulation + f32 epilogue; loose sanity bound only.
    params_bf16 = jax.tree_util.tree_map(lambda a: a.astype(jnp.bfloat16), params)
    out_bf16 = bert_encoder(hidden_states.astype(jnp.bfloat16),
                            add_mask.reshape(batch, 1, seq), params_bf16,
                            num_heads=heads, eps=eps)
    out_bf16 = jax.block_until_ready(out_bf16)
    err_bf16 = float(jnp.max(jnp.abs(out_bf16.astype(jnp.float32) - ref)))
    assert err_bf16 < 0.25, f"bf16 max abs err = {err_bf16}"

    print("KERNEL_OK")
</pallas_src>

<mosaic_0001>
module attributes {stable_mosaic.version = 11 : i64} {
  func.func @_linear_kernel(%arg0: i32, %arg1: memref<128x256xf32, #tpu.memory_space<vmem>>, %arg2: memref<256x768xf32, #tpu.memory_space<vmem>>, %arg3: memref<1x768xf32, #tpu.memory_space<vmem>>, %arg4: memref<128x768xf32, #tpu.memory_space<vmem>>) attributes {dimension_semantics = [#tpu.dimension_semantics<parallel>], iteration_bounds = array<i64: 2>, scalar_prefetch = 0 : i64, scratch_operands = 0 : i64, tpu.core_type = #tpu.core_type<tc>, window_params = [{transform_indices = @transform_0, window_bounds = array<i64: 128, 256>}, {pipeline_mode = #tpu.pipeline_mode<synchronous>, transform_indices = @transform_1, window_bounds = array<i64: 256, 768>}, {pipeline_mode = #tpu.pipeline_mode<synchronous>, transform_indices = @transform_2, window_bounds = array<i64: 1, 768>}, {transform_indices = @transform_3, window_bounds = array<i64: 128, 768>}]} {
    %c0 = arith.constant 0 : index
    %c0_0 = arith.constant 0 : index
    %0 = vector.load %arg1[%c0, %c0_0] : memref<128x256xf32, #tpu.memory_space<vmem>>, vector<128x256xf32>
    %c0_1 = arith.constant 0 : index
    %c0_2 = arith.constant 0 : index
    %1 = vector.load %arg2[%c0_1, %c0_2] : memref<256x768xf32, #tpu.memory_space<vmem>>, vector<256x768xf32>
    %cst = arith.constant dense<0.000000e+00> : vector<128x768xf32>
    %2 = tpu.matmul %0, %1, %cst {dimension_numbers = #tpu.dot_dimension_numbers<[1], [0], [0], [1], [0, 0, 1, 1], [], []>} : vector<128x256xf32>, vector<256x768xf32>, vector<128x768xf32> -> vector<128x768xf32>
    %c0_3 = arith.constant 0 : index
    %c0_4 = arith.constant 0 : index
    %3 = vector.load %arg3[%c0_3, %c0_4] : memref<1x768xf32, #tpu.memory_space<vmem>>, vector<1x768xf32>
    %4 = vector.broadcast %3 : vector<1x768xf32> to vector<128x768xf32>
    %5 = arith.addf %2, %4 : vector<128x768xf32>
    %c0_5 = arith.constant 0 : index
    %c0_6 = arith.constant 0 : index
    %6 = vector.load %arg4[%c0_5, %c0_6] : memref<128x768xf32, #tpu.memory_space<vmem>>, vector<128x768xf32>
    tpu.vector_store %arg4[%c0_5, %c0_6], %5 {strides = array<i32>} : memref<128x768xf32, #tpu.memory_space<vmem>>, vector<128x768xf32>,
    return
  }
  func.func @transform_0(%arg0: i32) -> (i32, i32) {
    %c0_i32 = arith.constant 0 : i32
    %c0_i32_0 = arith.constant 0 : i32
    return %arg0, %c0_i32 : i32, i32
  }
  func.func @transform_1(%arg0: i32) -> (i32, i32) {
    %c0_i32 = arith.constant 0 : i32
    %c0_i32_0 = arith.constant 0 : i32
    %c0_i32_1 = arith.constant 0 : i32
    return %c0_i32, %c0_i32_0 : i32, i32
  }
  func.func @transform_2(%arg0: i32) -> (i32, i32) {
    %c0_i32 = arith.constant 0 : i32
    %c0_i32_0 = arith.constant 0 : i32
    %c0_i32_1 = arith.constant 0 : i32
    return %c0_i32, %c0_i32_0 : i32, i32
  }
  func.func @transform_3(%arg0: i32) -> (i32, i32) {
    %c0_i32 = arith.constant 0 : i32
    %c0_i32_0 = arith.constant 0 : i32
    return %arg0, %c0_i32 : i32, i32
  }
}

</mosaic_0001>

<bundles_post_ra>
// kernel: tpu_custom_call.1
= control target key start
LH: loop header
LB: loop body
LE: loop exit
PB: predicated region body
PF: predicated region fallthrough
CT: control target
= control target key end

     0   :  { %8 = vsyncpa [#allocation3], 0  ;;  %s2208_s0 = inlined_call_operand.hbm [shape: f32[256,256], index: 0, kind: input, shape index: {}]   ;;  %s2209_s1 = inlined_call_operand.hbm [shape: f32[256,768], index: 1, kind: input, shape index: {}]   ;;  %s2210_s2 = inlined_call_operand.vmem [shape: f32[1,768], index: 2, kind: input, shape index: {}]   ;;  %s2211_s3 = inlined_call_operand.hbm [shape: f32[256,768], index: 3, kind: output, shape index: {}]  }
   0x1   :  { %10 = vsyncpa [#allocation3 + $0x1], 0 }
   0x2   :  { %11 = vsyncpa [#allocation6], 0 }
   0x3   :  { %12 = vsyncpa [#allocation4], 0 }
   0x4   :  { %14 = vsyncpa [#allocation4 + $0x1], 0  ;;  %s1606_s12 = smov 0   ;;  %s1608_s13 = smov 0  }
   0x5   :  { %s1610_s14 = smov 0   ;;  %s1612_s15 = smov 0  }
   0x6 LB: > { %s1627_s16 = sadd.s32 4294967295, %s1575_s15   ;;  %s1140_s17 = sadd.s32 4294967294, %s1575_s15   ;;  %s1575_s15 = sphi %s1612_s15, %s2231_s15   ;;  %s1571_s14 = sphi %s1610_s14, %s2230_s14   ;;  %s1567_s13 = sphi %s1608_s13, %s2229_s13   ;;  %s1563_s12 = sphi %s1606_s12, %s2228_s12  }
   0x7   : > { %p40_p0 = scmp.ne.s32.totalorder %s1567_s13, %s1563_s12  ;;  %p2212_p1 = scmp.eq.s32.totalorder %s1627_s16, 0 }
   0x8   : > { %p112_p3 = scmp.eq.s32.totalorder %s1140_s17, 1  ;;  %p1141_p5 = scmp.ge.s32.totalorder %s1575_s15, 1 }
   0x9   : > { %p1636_p4 = por %p2212_p1, %p40_p0  ;;  %p119_p7 = scmp.lt.s32.totalorder %s1575_s15, 3 }
   0xa   : > { %p1641_p6 = por %p112_p3, %p40_p0  ;;  %s1577_s21 = smov [#allocation5]  }
   0xb   : > { %s2215_s18 = scalar_select %p1636_p4, 1, 0 }
   0xc   : > { %s2216_s19 = scalar_select %p1641_p6, 1, 0 }
   0xd   : > { %p1646_p8 = pnand %p1141_p5, %p119_p7  ;;  %s131_s22 = sshll.u32 %s1577_s21, 4  ;;  %s1650_s22 = int_to_ptr.vmem [resolvable:$true] %s131_s22 }
   0xe   : > { %s1662_s24 = sadd.s32 1, %s1575_s15   ;;  %s27_s25 = sadd.s32 1, %s1571_s14 }
   0xf   : > { %s2217_s20 = scalar_select %p1646_p8, 1, 0 }
  0x10   : > { %p1392_p9 = pneg %p1646_p8  ;;  %s24_s26 = ssub.s32 %s1575_s15, %s1662_s24 }
  0x11   : > { %s1447_s29 = scalar_lea.hbm %s2209_s1, 24576 }
  0x12   : > { %p1657_p11 = pnand %p1392_p9, %p2212_p1  ;;  %p1448_p12 = scmp.ne.s32.totalorder %s2209_s1, %s1447_s29 }
  0x13   : > { %p1454_p5 = scmp.lt.u32.totalorder %s1447_s29, %s2209_s1 }
  0x14   : > { %p1449_p13 = pneg %p1657_p11 }
  0x16   : > { %p1450_p0 = pnand %p1449_p13, %p1448_p12 }
  0x18   : > { %p1451_p3 = pneg %p1450_p0 }
  0x1a   : > { %p1456_p7 = pnand %p1454_p5, %p1451_p3 }
  0x1c   : > { %1459 = shalt.err (!%p1456_p7)
}
  0x1d   : > { %s1460_s7 = scalar_lea.vmem %s1650_s22, 24576  ;;  %p1468_p2 = scmp.lt.s32.totalorder %s1650_s22, %s1650_s22 }
  0x1e   : > { %p1461_p9 = scmp.ne.s32.totalorder %s1650_s22, %s1460_s7  ;;  %p1469_p6 = scmp.lt.s32.totalorder %s1460_s7, %s1460_s7 }
  0x20   : > { %p1463_p10 = pnand %p1461_p9, %p1449_p13  ;;  %p1470_p4 = por %p1469_p6, %p1468_p2 }
  0x22   : > { %p1464_p1 = pneg %p1463_p10 }
  0x24   : > { %p1471_p8 = pnand %p1470_p4, %p1464_p1 }
  0x26   : > { %1474 = shalt.err (!%p1471_p8)
}
  0x27   : > { %s1578_s8 = smov 768   ;;  %s1579_s9 = smov 48  }
  0x28   : > { %1395 = dma.hbm_to_vmem [thread:$0]  (!%p1657_p11), %s2209_s1, 24576, %s1650_s22, [#allocation6], %s1578_s8, %s1578_s8, %s1579_s9  }
  0x29   : > { %p25_p2 = scmp.eq.s32.totalorder %s24_s26, 0  ;;  %p34_p1 = scmp.ne.s32.totalorder %s1571_s14, %s1567_s13 }
  0x2a   : > { %p35_p4 = scmp.eq.s32.totalorder %s1575_s15, 0  ;;  %p1405_p6 = scmp.lt.s32.totalorder %s1575_s15, 2 }
  0x2b   : > { %s1693_s17 = scalar_select %p25_p2, %s1571_s14, %s27_s25  }
  0x2c   : > { %p36_p8 = por %p35_p4, %p34_p1  ;;  %p2219_p10 = scmp.eq.s32.totalorder %s1627_s16, 1 }
  0x2d   : > { %s148_s27 = sand.u32 1, %s1571_s14   ;;  %s1157_s28 = sshll.u32 %s1575_s15, 12 }
  0x2e   : > { %p1697_p12 = por %p2219_p10, %p34_p1  ;;  %s1144_s29 = sshll.u32 %s148_s27, 8 }
  0x2f   : > { %s1706_s4 = scalar_lea.hbm %s2208_s0, %s1157_s28  ;;  %s152_s22 = scalar_lea.vmem [#allocation2], %s1144_s29 }
  0x30   : > { %s160_s25 = sshll.u32 %s152_s22, 4  ;;  %p1708_p11 = pnand %p1405_p6, %p36_p8  ;;  %s1712_s25 = int_to_ptr.vmem [resolvable:$true] %s160_s25 }
  0x31   : > { %s1714_s5 = scalar_lea.sflag [#allocation3], %s148_s27  ;;  %s1475_s6 = scalar_lea.hbm %s1706_s4, 4096 }
  0x32   : > { %p1476_p13 = scmp.ne.s32.totalorder %s1706_s4, %s1475_s6  ;;  %p1477_p0 = pneg %p1708_p11 }
  0x33   : > { %s1480_s9 = scalar_lea.hbm %s2208_s0, 8192  ;;  %p1481_p7 = scmp.lt.u32.totalorder %s1706_s4, %s2208_s0 }
  0x34   : > { %p1478_p3 = pnand %p1477_p0, %p1476_p13  ;;  %p1482_p9 = scmp.lt.u32.totalorder %s1480_s9, %s1475_s6 }
  0x35   : > { %p1484_p1 = scmp.lt.u32.totalorder %s1475_s6, %s1706_s4 }
  0x36   : > { %p1479_p5 = pneg %p1478_p3  ;;  %p1483_p2 = por %p1482_p9, %p1481_p7 }
  0x38   : > { %p1485_p4 = por %p1484_p1, %p1483_p2 }
  0x3a   : > { %p1486_p6 = pnand %p1485_p4, %p1479_p5 }
  0x3c   : > { %1489 = shalt.err (!%p1486_p6)
}
  0x3d   : > { %s1490_s27 = scalar_lea.vmem %s1712_s25, 4096  ;;  %s1580_s28 = smov [#allocation2]  }
  0x3e   : > { %p1491_p8 = scmp.ne.s32.totalorder %s1712_s25, %s1490_s27  ;;  %s1495_s29 = sshll.u32 %s1580_s28, 4  ;;  %s1496_s29 = int_to_ptr.vmem [resolvable:$false] %s1495_s29 }
  0x3f   : > { %s1497_s23 = scalar_lea.vmem %s1496_s29, 8192  ;;  %p1498_p3 = scmp.lt.s32.totalorder %s1712_s25, %s1496_s29 }
  0x40   : > { %p1493_p10 = pnand %p1491_p8, %p1477_p0  ;;  %p1499_p7 = scmp.lt.s32.totalorder %s1497_s23, %s1490_s27 }
  0x42   : > { %p1494_p13 = pneg %p1493_p10  ;;  %p1500_p9 = por %p1499_p7, %p1498_p3 }
  0x44   : > { %p1501_p2 = pnand %p1500_p9, %p1494_p13 }
  0x46   : > { %1504 = shalt.err (!%p1501_p2)
}
  0x47   : > { %s1581_s30 = smov 256   ;;  %s1582_s22 = smov 16  }
  0x48   : > { %1399 = dma.hbm_to_vmem [thread:$0]  (!%p1708_p11), %s1706_s4, 4096, %s1712_s25, %s1714_s5, %s1581_s30, %s1581_s30, %s1582_s22  }
  0x49   : > { %p2222_p0 = scmp.ne.s32.totalorder %s2217_s20, 0 }
  0x4a   : > { %s1745_s6 = sand.u32 (!%p2222_p0), 1, %s1567_s13   ;;  %p2223_p5 = scmp.ne.s32.totalorder (!%p2222_p0), %s2215_s18, 0 }
  0x4b   : > { %172 = sbr.rel (%p2222_p0) target bundleno = 477 (0x1dd), region = 32  ;;  %s1149_s7 = sshll.u32 (!%p2222_p0), %s1745_s6, 8 }
  0x4c   : > { %s175_s8 = scalar_lea.sflag (!%p2222_p0), [#allocation3], %s1745_s6  ;;  %s1749_s9 = scalar_lea.vmem (!%p2222_p0), [#allocation2], %s1149_s7 }
  0x52   : > { %1550 = dma.done.wait (%p2223_p5), %s175_s8, 4096  }
  0x53   : > { %1552 = vsyncadd (%p2223_p5), %s175_s8, 4294963200  ;;  %p2224_p11 = scmp.eq.s32.totalorder %s1627_s16, 0 }
  0x55   : > { %1554 = dma.done.wait (%p2224_p11), [#allocation6], 24576   ;;  %p2225_p1 = pmov %p2224_p11 }
  0x56   : > { %v240_v0 = vld [vmem:[#allocation5 + $0x8] sm:$0xff]  ;;  %v246_v1 = vld [vmem:[#allocation5 + $0x38] sm:$0xff]  ;;  %v239_v5 = vld [vmem:[#allocation5] sm:$0xff]  ;;  %s1382_s4 = smul.u32 768, %s1745_s6  ;;  %s1043_s27 = scalar_lea.sflag [#allocation4], %s1745_s6 }
  0x57   : > { %1556 = vsyncadd (%p2225_p1), [#allocation6], 4294942720  ;;  %v242_v2 = vld [vmem:[#allocation5 + $0x18] sm:$0xff]  ;;  %v1158_v3 = vpack.c.bf16 %v246_v1, %v240_v0  ;;  %v248_v4 = vld [vmem:[#allocation5 + $0x48] sm:$0xff]  ;;  %s1383_s26 = smul.u32 12288, %s1627_s16  ;;  %s1583_s29 = smov [#allocation7]  }
  0x58   : > { %v245_v6 = vld [vmem:[#allocation5 + $0x30] sm:$0xff]  ;;  %v1222_v7 = vpack.c.bf16 %v248_v4, %v242_v2  ;;  %v247_v10 = vld [vmem:[#allocation5 + $0x40] sm:$0xff]  ;;  %v252_v11 = vld [vmem:[#allocation5 + $0x68] sm:$0xff]  ;;  %s1958_s25 = scalar_lea.vmem [#allocation7], %s1382_s4  ;;  %s1509_s23 = sshll.u32 %s1583_s29, 4  ;;  %s1510_s23 = int_to_ptr.vmem [resolvable:$false] %s1509_s23 }
  0x59   : > { %v1160_v8 = vpack.c.bf16 %v245_v6, %v239_v5  ;;  %v241_v9 = vld [vmem:[#allocation5 + $0x10] sm:$0xff]  ;;  %1159 = vmatprep.subr.bf16.mxu0 %v1158_v3  ;;  %v258_v13 = vld [vmem:[#allocation5 + $0x98] sm:$0xff]  ;;  %v260_v15 = vld [vmem:[#allocation5 + $0xa8] sm:$0xff]  ;;  %s1057_s5 = sshll.u32 %s1958_s25, 4  ;;  %s2157_s11 = scalar_lea.hbm %s2211_s3, %s1383_s26  ;;  %s2159_s5 = int_to_ptr.vmem [resolvable:$true] %s1057_s5 }
  0x5a   : > { %v1224_v12 = vpack.c.bf16 %v247_v10, %v241_v9  ;;  %v254_v14 = vld [vmem:[#allocation5 + $0x78] sm:$0xff]  ;;  %1223 = vmatprep.subr.bf16.mxu1 %v1222_v7  ;;  %v1162_v16 = vpack.c.bf16 %v258_v13, %v252_v11  ;;  %v251_v18 = vld [vmem:[#allocation5 + $0x60] sm:$0xff]  ;;  %v257_v19 = vld [vmem:[#allocation5 + $0x90] sm:$0xff]  ;;  %s1505_s28 = scalar_lea.vmem %s2159_s5, 12288  ;;  %s1511_s30 = scalar_lea.vmem %s1510_s23, 24576 }
  0x5b   : > { %1161 = vmatpush1.bf16.msra.mxu0 %v1160_v8  ;;  %v1226_v17 = vpack.c.bf16 %v260_v15, %v254_v14  ;;  %v253_v20 = vld [vmem:[#allocation5 + $0x70] sm:$0xff]  ;;  %v1164_v21 = vpack.c.bf16 %v257_v19, %v251_v18  ;;  %v259_v22 = vld [vmem:[#allocation5 + $0xa0] sm:$0xff]  ;;  %v264_v23 = vld [vmem:[#allocation5 + $0xc8] sm:$0xff]  ;;  %p1506_p4 = scmp.ne.s32.totalorder %s2159_s5, %s1505_s28  ;;  %p1512_p10 = scmp.lt.s32.totalorder %s2159_s5, %s1510_s23 }
  0x5c   : > { %1225 = vmatpush1.bf16.msra.mxu1 %v1224_v12  ;;  %v270_v24 = vld [vmem:[#allocation5 + $0xf8] sm:$0xff]  ;;  %1163 = vmatprep.subr.bf16.mxu0 %v1162_v16  ;;  %v1228_v25 = vpack.c.bf16 %v259_v22, %v253_v20  ;;  %v272_v28 = vld [vmem:[#allocation5 + $0x108] sm:$0xff]  ;;  %v263_v29 = vld [vmem:[#allocation5 + $0xc0] sm:$0xff]  ;;  %p1513_p13 = scmp.lt.s32.totalorder %s1511_s30, %s1505_s28 }
  0x5d   : > { %1227 = vmatprep.subr.bf16.mxu1 %v1226_v17  ;;  %v1166_v26 = vpack.c.bf16 %v270_v24, %v264_v23  ;;  %v266_v27 = vld [vmem:[#allocation5 + $0xd8] sm:$0xff]  ;;  %v269_v31 = vld [vmem:[#allocation5 + $0xf0] sm:$0xff]  ;;  %v271_v33 = vld [vmem:[#allocation5 + $0x100] sm:$0xff]  ;;  %p1507_p6 = pnand %p1506_p4, %p1697_p12 }
  0x5e   : > { %v1230_v30 = vpack.c.bf16 %v272_v28, %v266_v27  ;;  %v265_v32 = vld [vmem:[#allocation5 + $0xd0] sm:$0xff]  ;;  %v1168_v34 = vpack.c.bf16 %v269_v31, %v263_v29  ;;  %v276_v35 = vld [vmem:[#allocation5 + $0x128] sm:$0xff]  ;;  %v282_v36 = vld [vmem:[#allocation5 + $0x158] sm:$0xff]  ;;  %p1514_p3 = por %p1513_p13, %p1512_p10 }
  0x5f   : > { %1165 = vmatpush1.bf16.msra.mxu0 %v1164_v21  ;;  %v278_v37 = vld [vmem:[#allocation5 + $0x138] sm:$0xff]  ;;  %v1232_v38 = vpack.c.bf16 %v271_v33, %v265_v32  ;;  %v1170_v39 = vpack.c.bf16 %v282_v36, %v276_v35  ;;  %v284_v40 = vld [vmem:[#allocation5 + $0x168] sm:$0xff]  ;;  %v275_v41 = vld [vmem:[#allocation5 + $0x120] sm:$0xff]  ;;  %p1508_p8 = pneg %p1507_p6 }
  0x60   : > { %1229 = vmatpush1.bf16.msra.mxu1 %v1228_v25  ;;  %1167 = vmatprep.subr.bf16.mxu0 %v1166_v26  ;;  %v281_v42 = vld [vmem:[#allocation5 + $0x150] sm:$0xff]  ;;  %v1234_v43 = vpack.c.bf16 %v284_v40, %v278_v37  ;;  %v283_v45 = vld [vmem:[#allocation5 + $0x160] sm:$0xff]  ;;  %v288_v46 = vld [vmem:[#allocation5 + $0x188] sm:$0xff] }
  0x61   : > { %1231 = vmatprep.subr.bf16.mxu1 %v1230_v30  ;;  %v277_v44 = vld [vmem:[#allocation5 + $0x130] sm:$0xff]  ;;  %v294_v47 = vld [vmem:[#allocation5 + $0x1b8] sm:$0xff]  ;;  %v296_v49 = vld [vmem:[#allocation5 + $0x1c8] sm:$0xff]  ;;  %v1172_v50 = vpack.c.bf16 %v281_v42, %v275_v41  ;;  %p1515_p7 = pnand %p1514_p3, %p1508_p8 }
  0x62   : > { %v290_v48 = vld [vmem:[#allocation5 + $0x198] sm:$0xff]  ;;  %v1236_v51 = vpack.c.bf16 %v283_v45, %v277_v44  ;;  %v1174_v52 = vpack.c.bf16 %v294_v47, %v288_v46  ;;  %v287_v53 = vld [vmem:[#allocation5 + $0x180] sm:$0xff]  ;;  %v293_v54 = vld [vmem:[#allocation5 + $0x1b0] sm:$0xff] }
  0x63   : > { %1169 = vmatpush1.bf16.msra.mxu0 %v1168_v34  ;;  %v289_v55 = vld [vmem:[#allocation5 + $0x190] sm:$0xff]  ;;  %v1238_v56 = vpack.c.bf16 %v296_v49, %v290_v48  ;;  %v295_v57 = vld [vmem:[#allocation5 + $0x1c0] sm:$0xff]  ;;  %v300_v58 = vld [vmem:[#allocation5 + $0x1e8] sm:$0xff]  ;;  %v1176_v62 = vpack.c.bf16 %v293_v54, %v287_v53 }
  0x64   : > { %1233 = vmatpush1.bf16.msra.mxu1 %v1232_v38  ;;  %1171 = vmatprep.subr.bf16.mxu0 %v1170_v39  ;;  %v306_v59 = vld [vmem:[#allocation5 + $0x218] sm:$0xff]  ;;  %v308_v61 = vld [vmem:[#allocation5 + $0x228] sm:$0xff]  ;;  %v1240_v63 = vpack.c.bf16 %v295_v57, %v289_v55  ;;  %v299_v1 = vld [vmem:[#allocation5 + $0x1e0] sm:$0xff] }
  0x65   : > { %1235 = vmatprep.subr.bf16.mxu1 %v1234_v43  ;;  %v302_v60 = vld [vmem:[#allocation5 + $0x1f8] sm:$0xff]  ;;  %v1178_v0 = vpack.c.bf16 %v306_v59, %v300_v58  ;;  %v305_v2 = vld [vmem:[#allocation5 + $0x210] sm:$0xff]  ;;  %v307_v5 = vld [vmem:[#allocation5 + $0x220] sm:$0xff] }
  0x66   : > { %v301_v3 = vld [vmem:[#allocation5 + $0x1f0] sm:$0xff]  ;;  %v1242_v4 = vpack.c.bf16 %v308_v61, %v302_v60  ;;  %v312_v6 = vld [vmem:[#allocation5 + $0x248] sm:$0xff]  ;;  %v318_v7 = vld [vmem:[#allocation5 + $0x278] sm:$0xff]  ;;  %v1180_v10 = vpack.c.bf16 %v305_v2, %v299_v1 }
  0x67   : > { %1173 = vmatpush1.bf16.msra.mxu0 %v1172_v50  ;;  %v314_v8 = vld [vmem:[#allocation5 + $0x258] sm:$0xff]  ;;  %v320_v9 = vld [vmem:[#allocation5 + $0x288] sm:$0xff]  ;;  %v1244_v11 = vpack.c.bf16 %v307_v5, %v301_v3  ;;  %v1182_v12 = vpack.c.bf16 %v318_v7, %v312_v6  ;;  %v311_v13 = vld [vmem:[#allocation5 + $0x240] sm:$0xff] }
  0x68   : > { %1237 = vmatpush1.bf16.msra.mxu1 %v1236_v51  ;;  %1175 = vmatprep.subr.bf16.mxu0 %v1174_v52  ;;  %v317_v14 = vld [vmem:[#allocation5 + $0x270] sm:$0xff]  ;;  %v1246_v16 = vpack.c.bf16 %v320_v9, %v314_v8  ;;  %v319_v17 = vld [vmem:[#allocation5 + $0x280] sm:$0xff]  ;;  %v324_v18 = vld [vmem:[#allocation5 + $0x2a8] sm:$0xff] }
  0x69   : > { %1239 = vmatprep.subr.bf16.mxu1 %v1238_v56  ;;  %v313_v15 = vld [vmem:[#allocation5 + $0x250] sm:$0xff]  ;;  %v330_v19 = vld [vmem:[#allocation5 + $0x2d8] sm:$0xff]  ;;  %v332_v21 = vld [vmem:[#allocation5 + $0x2e8] sm:$0xff]  ;;  %v1184_v22 = vpack.c.bf16 %v317_v14, %v311_v13 }
  0x6a   : > { %v326_v20 = vld [vmem:[#allocation5 + $0x2b8] sm:$0xff]  ;;  %v1248_v23 = vpack.c.bf16 %v319_v17, %v313_v15  ;;  %v1186_v24 = vpack.c.bf16 %v330_v19, %v324_v18  ;;  %v323_v25 = vld [vmem:[#allocation5 + $0x2a0] sm:$0xff]  ;;  %v329_v26 = vld [vmem:[#allocation5 + $0x2d0] sm:$0xff] }
  0x6b   : > { %1177 = vmatpush1.bf16.msra.mxu0 %v1176_v62  ;;  %v325_v27 = vld [vmem:[#allocation5 + $0x2b0] sm:$0xff]  ;;  %v1250_v28 = vpack.c.bf16 %v332_v21, %v326_v20  ;;  %v331_v29 = vld [vmem:[#allocation5 + $0x2e0] sm:$0xff]  ;;  %v336_v30 = vld [vmem:[#allocation5 + $0x308] sm:$0xff]  ;;  %v1188_v34 = vpack.c.bf16 %v329_v26, %v323_v25 }
  0x6c   : > { %1241 = vmatpush1.bf16.msra.mxu1 %v1240_v63  ;;  %1179 = vmatprep.subr.bf16.mxu0 %v1178_v0  ;;  %v342_v31 = vld [vmem:[#allocation5 + $0x338] sm:$0xff]  ;;  %v344_v33 = vld [vmem:[#allocation5 + $0x348] sm:$0xff]  ;;  %v1252_v35 = vpack.c.bf16 %v331_v29, %v325_v27  ;;  %v335_v37 = vld [vmem:[#allocation5 + $0x300] sm:$0xff] }
  0x6d   : > { %1243 = vmatprep.subr.bf16.mxu1 %v1242_v4  ;;  %v338_v32 = vld [vmem:[#allocation5 + $0x318] sm:$0xff]  ;;  %v1190_v36 = vpack.c.bf16 %v342_v31, %v336_v30  ;;  %v341_v38 = vld [vmem:[#allocation5 + $0x330] sm:$0xff]  ;;  %v343_v41 = vld [vmem:[#allocation5 + $0x340] sm:$0xff] }
  0x6e   : > { %v337_v39 = vld [vmem:[#allocation5 + $0x310] sm:$0xff]  ;;  %v1254_v40 = vpack.c.bf16 %v344_v33, %v338_v32  ;;  %v348_v42 = vld [vmem:[#allocation5 + $0x368] sm:$0xff]  ;;  %v354_v43 = vld [vmem:[#allocation5 + $0x398] sm:$0xff]  ;;  %v1192_v46 = vpack.c.bf16 %v341_v38, %v335_v37 }
  0x6f   : > { %1181 = vmatpush1.bf16.msra.mxu0 %v1180_v10  ;;  %v350_v44 = vld [vmem:[#allocation5 + $0x378] sm:$0xff]  ;;  %v356_v45 = vld [vmem:[#allocation5 + $0x3a8] sm:$0xff]  ;;  %v1256_v47 = vpack.c.bf16 %v343_v41, %v337_v39  ;;  %v1194_v48 = vpack.c.bf16 %v354_v43, %v348_v42  ;;  %v347_v49 = vld [vmem:[#allocation5 + $0x360] sm:$0xff] }
  0x70   : > { %1245 = vmatpush1.bf16.msra.mxu1 %v1244_v11  ;;  %1183 = vmatprep.subr.bf16.mxu0 %v1182_v12  ;;  %v353_v50 = vld [vmem:[#allocation5 + $0x390] sm:$0xff]  ;;  %v1258_v52 = vpack.c.bf16 %v356_v45, %v350_v44  ;;  %v355_v53 = vld [vmem:[#allocation5 + $0x3a0] sm:$0xff]  ;;  %v360_v54 = vld [vmem:[#allocation5 + $0x3c8] sm:$0xff] }
  0x71   : > { %1247 = vmatprep.subr.bf16.mxu1 %v1246_v16  ;;  %v349_v51 = vld [vmem:[#allocation5 + $0x370] sm:$0xff]  ;;  %v366_v55 = vld [vmem:[#allocation5 + $0x3f8] sm:$0xff]  ;;  %v368_v57 = vld [vmem:[#allocation5 + $0x408] sm:$0xff]  ;;  %v1196_v58 = vpack.c.bf16 %v353_v50, %v347_v49 }
  0x72   : > { %v362_v56 = vld [vmem:[#allocation5 + $0x3d8] sm:$0xff]  ;;  %v1260_v59 = vpack.c.bf16 %v355_v53, %v349_v51  ;;  %v1198_v60 = vpack.c.bf16 %v366_v55, %v360_v54  ;;  %v359_v61 = vld [vmem:[#allocation5 + $0x3c0] sm:$0xff]  ;;  %v365_v62 = vld [vmem:[#allocation5 + $0x3f0] sm:$0xff] }
  0x73   : > { %1185 = vmatpush1.bf16.msra.mxu0 %v1184_v22  ;;  %v361_v63 = vld [vmem:[#allocation5 + $0x3d0] sm:$0xff]  ;;  %v1262_v0 = vpack.c.bf16 %v368_v57, %v362_v56  ;;  %v367_v1 = vld [vmem:[#allocation5 + $0x400] sm:$0xff]  ;;  %v372_v2 = vld [vmem:[#allocation5 + $0x428] sm:$0xff]  ;;  %v1200_v6 = vpack.c.bf16 %v365_v62, %v359_v61 }
  0x74   : > { %1249 = vmatpush1.bf16.msra.mxu1 %v1248_v23  ;;  %1187 = vmatprep.subr.bf16.mxu0 %v1186_v24  ;;  %v378_v3 = vld [vmem:[#allocation5 + $0x458] sm:$0xff]  ;;  %v380_v5 = vld [vmem:[#allocation5 + $0x468] sm:$0xff]  ;;  %v371_v7 = vld [vmem:[#allocation5 + $0x420] sm:$0xff]  ;;  %v1264_v8 = vpack.c.bf16 %v367_v1, %v361_v63 }
  0x75   : > { %1251 = vmatprep.subr.bf16.mxu1 %v1250_v28  ;;  %v374_v4 = vld [vmem:[#allocation5 + $0x438] sm:$0xff]  ;;  %v1202_v9 = vpack.c.bf16 %v378_v3, %v372_v2  ;;  %v377_v10 = vld [vmem:[#allocation5 + $0x450] sm:$0xff]  ;;  %v379_v12 = vld [vmem:[#allocation5 + $0x460] sm:$0xff] }
  0x76   : > { %v373_v11 = vld [vmem:[#allocation5 + $0x430] sm:$0xff]  ;;  %v1266_v13 = vpack.c.bf16 %v380_v5, %v374_v4  ;;  %v384_v14 = vld [vmem:[#allocation5 + $0x488] sm:$0xff]  ;;  %v390_v15 = vld [vmem:[#allocation5 + $0x4b8] sm:$0xff]  ;;  %v1204_v19 = vpack.c.bf16 %v377_v10, %v371_v7 }
  0x77   : > { %1189 = vmatpush1.bf16.msra.mxu0 %v1188_v34  ;;  %v1760_v16 = vld [vmem:[%s1749_s9 + $0x8] sm:$0xff]  ;;  %v386_v17 = vld [vmem:[#allocation5 + $0x498] sm:$0xff]  ;;  %v1268_v20 = vpack.c.bf16 %v379_v12, %v373_v11  ;;  %v1206_v21 = vpack.c.bf16 %v390_v15, %v384_v14  ;;  %v383_v22 = vld [vmem:[#allocation5 + $0x480] sm:$0xff] }
  0x78   : > { %1253 = vmatpush1.bf16.msra.mxu1 %v1252_v35  ;;  %1191 = vmatprep.subr.bf16.mxu0 %v1190_v36  ;;  %v392_v18 = vld [vmem:[#allocation5 + $0x4c8] sm:$0xff]  ;;  %v389_v23 = vld [vmem:[#allocation5 + $0x4b0] sm:$0xff]  ;;  %v391_v26 = vld [vmem:[#allocation5 + $0x4c0] sm:$0xff] }
  0x79   : > { %1255 = vmatprep.subr.bf16.mxu1 %v1254_v40  ;;  %527 = vmatprep.mubr.f32.mxu0 %v1760_v16  ;;  %v385_v24 = vld [vmem:[#allocation5 + $0x490] sm:$0xff]  ;;  %v1270_v25 = vpack.c.bf16 %v392_v18, %v386_v17  ;;  %v396_v27 = vld [vmem:[#allocation5 + $0x4e8] sm:$0xff]  ;;  %v402_v28 = vld [vmem:[#allocation5 + $0x518] sm:$0xff]  ;;  %v1208_v31 = vpack.c.bf16 %v389_v23, %v383_v22 }
  0x7a   : > { %688 = vmatprep.mubr.f32.mxu1 %v1760_v16  ;;  %v398_v29 = vld [vmem:[#allocation5 + $0x4f8] sm:$0xff]  ;;  %v404_v30 = vld [vmem:[#allocation5 + $0x528] sm:$0xff]  ;;  %v1272_v32 = vpack.c.bf16 %v391_v26, %v385_v24  ;;  %v1210_v33 = vpack.c.bf16 %v402_v28, %v396_v27  ;;  %v395_v34 = vld [vmem:[#allocation5 + $0x4e0] sm:$0xff] }
  0x7b   : > { %1193 = vmatpush1.bf16.msra.mxu0 %v1192_v46  ;;  %v401_v35 = vld [vmem:[#allocation5 + $0x510] sm:$0xff]  ;;  %v1274_v37 = vpack.c.bf16 %v404_v30, %v398_v29  ;;  %v403_v38 = vld [vmem:[#allocation5 + $0x520] sm:$0xff]  ;;  %v408_v39 = vld [vmem:[#allocation5 + $0x548] sm:$0xff] }
  0x7c   : > { %1257 = vmatpush1.bf16.msra.mxu1 %v1256_v47  ;;  %1195 = vmatprep.subr.bf16.mxu0 %v1194_v48  ;;  %v397_v36 = vld [vmem:[#allocation5 + $0x4f0] sm:$0xff]  ;;  %v414_v40 = vld [vmem:[#allocation5 + $0x578] sm:$0xff]  ;;  %v416_v42 = vld [vmem:[#allocation5 + $0x588] sm:$0xff]  ;;  %v1212_v43 = vpack.c.bf16 %v401_v35, %v395_v34 }
  0x7d   : > { %1259 = vmatprep.subr.bf16.mxu1 %v1258_v52  ;;  %v410_v41 = vld [vmem:[#allocation5 + $0x558] sm:$0xff]  ;;  %v1276_v44 = vpack.c.bf16 %v403_v38, %v397_v36  ;;  %v1214_v45 = vpack.c.bf16 %v414_v40, %v408_v39  ;;  %v407_v46 = vld [vmem:[#allocation5 + $0x540] sm:$0xff]  ;;  %v413_v47 = vld [vmem:[#allocation5 + $0x570] sm:$0xff] }
  0x7e   : > { %v409_v48 = vld [vmem:[#allocation5 + $0x550] sm:$0xff]  ;;  %v1278_v49 = vpack.c.bf16 %v416_v42, %v410_v41  ;;  %v415_v50 = vld [vmem:[#allocation5 + $0x580] sm:$0xff]  ;;  %v420_v51 = vld [vmem:[#allocation5 + $0x5a8] sm:$0xff]  ;;  %v1216_v55 = vpack.c.bf16 %v413_v47, %v407_v46 }
  0x7f   : > { %1197 = vmatpush1.bf16.msra.mxu0 %v1196_v58  ;;  %v426_v52 = vld [vmem:[#allocation5 + $0x5d8] sm:$0xff]  ;;  %v428_v54 = vld [vmem:[#allocation5 + $0x5e8] sm:$0xff]  ;;  %v1280_v56 = vpack.c.bf16 %v415_v50, %v409_v48  ;;  %v419_v58 = vld [vmem:[#allocation5 + $0x5a0] sm:$0xff] }
  0x80   : > { %1261 = vmatpush1.bf16.msra.mxu1 %v1260_v59  ;;  %1199 = vmatprep.subr.bf16.mxu0 %v1198_v60  ;;  %v422_v53 = vld [vmem:[#allocation5 + $0x5b8] sm:$0xff]  ;;  %v1218_v57 = vpack.c.bf16 %v426_v52, %v420_v51  ;;  %v425_v59 = vld [vmem:[#allocation5 + $0x5d0] sm:$0xff]  ;;  %v427_v62 = vld [vmem:[#allocation5 + $0x5e0] sm:$0xff] }
  0x81   : > { %1263 = vmatprep.subr.bf16.mxu1 %v1262_v0  ;;  %v421_v60 = vld [vmem:[#allocation5 + $0x5b0] sm:$0xff]  ;;  %v1282_v61 = vpack.c.bf16 %v428_v54, %v422_v53  ;;  %v244_v63 = vld [vmem:[#allocation5 + $0x28] sm:$0xff]  ;;  %v250_v0 = vld [vmem:[#allocation5 + $0x58] sm:$0xff]  ;;  %v1220_v1 = vpack.c.bf16 %v425_v59, %v419_v58 }
  0x82   : > { %v1284_v2 = vpack.c.bf16 %v427_v62, %v421_v60  ;;  %v1286_v3 = vpack.c.bf16 %v250_v0, %v244_v63  ;;  %v243_v4 = vld [vmem:[#allocation5 + $0x20] sm:$0xff]  ;;  %v249_v5 = vld [vmem:[#allocation5 + $0x50] sm:$0xff]  ;;  %v262_v7 = vld [vmem:[#allocation5 + $0xb8] sm:$0xff] }
  0x83   : > { %1201 = vmatpush1.bf16.msra.mxu0 %v1200_v6  ;;  %v256_v6 = vld [vmem:[#allocation5 + $0x88] sm:$0xff]  ;;  %v255_v10 = vld [vmem:[#allocation5 + $0x80] sm:$0xff]  ;;  %v261_v11 = vld [vmem:[#allocation5 + $0xb0] sm:$0xff] }
  0x84   : > { %1265 = vmatpush1.bf16.msra.mxu1 %v1264_v8  ;;  %1203 = vmatprep.subr.bf16.mxu0 %v1202_v9  ;;  %v1765_v8 = vld [vmem:[%s1749_s9] sm:$0xff]  ;;  %v1288_v9 = vpack.c.bf16 %v249_v5, %v243_v4  ;;  %v1768_v12 = vld [vmem:[%s1749_s9 + $0x18] sm:$0xff]  ;;  %v268_v14 = vld [vmem:[#allocation5 + $0xe8] sm:$0xff]  ;;  %v1292_v18 = vpack.c.bf16 %v261_v11, %v255_v10 }
  0x85   : > { %1267 = vmatprep.subr.bf16.mxu1 %v1266_v13  ;;  %v1290_v13 = vpack.c.bf16 %v262_v7, %v256_v6  ;;  %v274_v15 = vld [vmem:[#allocation5 + $0x118] sm:$0xff]  ;;  %v1773_v17 = vld [vmem:[%s1749_s9 + $0x10] sm:$0xff]  ;;  %v280_v23 = vld [vmem:[#allocation5 + $0x148] sm:$0xff] }
  0x86   : > { %v1294_v22 = vpack.c.bf16 %v274_v15, %v268_v14  ;;  %v286_v24 = vld [vmem:[#allocation5 + $0x178] sm:$0xff]  ;;  %v279_v27 = vld [vmem:[#allocation5 + $0x140] sm:$0xff]  ;;  %v285_v28 = vld [vmem:[#allocation5 + $0x170] sm:$0xff] }
  0x87   : > { %1205 = vmatpush1.bf16.msra.mxu0 %v1204_v19  ;;  %v267_v19 = vld [vmem:[#allocation5 + $0xe0] sm:$0xff]  ;;  %v1788_v29 = vld [vmem:[%s1749_s9 + $0x38] sm:$0xff]  ;;  %v1298_v30 = vpack.c.bf16 %v286_v24, %v280_v23  ;;  %v1300_v34 = vpack.c.bf16 %v285_v28, %v279_v27  ;;  %v297_v36 = vld [vmem:[#allocation5 + $0x1d0] sm:$0xff] }
  0x88   : > { %1269 = vmatpush1.bf16.msra.mxu1 %v1268_v20  ;;  %1207 = vmatprep.subr.bf16.mxu0 %v1206_v21  ;;  %v273_v20 = vld [vmem:[#allocation5 + $0x110] sm:$0xff]  ;;  %v1778_v21 = vld [vmem:[%s1749_s9 + $0x28] sm:$0xff]  ;;  %v291_v35 = vld [vmem:[#allocation5 + $0x1a0] sm:$0xff] }
  0x89   : > { %1271 = vmatprep.subr.bf16.mxu1 %v1270_v25  ;;  %v1783_v25 = vld [vmem:[%s1749_s9 + $0x20] sm:$0xff]  ;;  %v1296_v26 = vpack.c.bf16 %v273_v20, %v267_v19  ;;  %v304_v39 = vld [vmem:[#allocation5 + $0x208] sm:$0xff]  ;;  %v310_v40 = vld [vmem:[#allocation5 + $0x238] sm:$0xff]  ;;  %v1304_v42 = vpack.c.bf16 %v297_v36, %v291_v35 }
  0x8a   : > { %v1803_v41 = vld [vmem:[%s1749_s9 + $0x40] sm:$0xff]  ;;  %v1306_v46 = vpack.c.bf16 %v310_v40, %v304_v39  ;;  %v316_v47 = vld [vmem:[#allocation5 + $0x268] sm:$0xff]  ;;  %v322_v48 = vld [vmem:[#allocation5 + $0x298] sm:$0xff] }
  0x8b   : > { %1209 = vmatpush1.bf16.msra.mxu0 %v1208_v31  ;;  %v292_v31 = vld [vmem:[#allocation5 + $0x1a8] sm:$0xff]  ;;  %v315_v51 = vld [vmem:[#allocation5 + $0x260] sm:$0xff]  ;;  %v321_v52 = vld [vmem:[#allocation5 + $0x290] sm:$0xff]  ;;  %v1310_v54 = vpack.c.bf16 %v322_v48, %v316_v47 }
  0x8c   : > { %1273 = vmatpush1.bf16.msra.mxu1 %v1272_v32  ;;  %1211 = vmatprep.subr.bf16.mxu0 %v1210_v33  ;;  %v298_v32 = vld [vmem:[#allocation5 + $0x1d8] sm:$0xff]  ;;  %v1793_v33 = vld [vmem:[%s1749_s9 + $0x30] sm:$0xff]  ;;  %v1818_v53 = vld [vmem:[%s1749_s9 + $0x68] sm:$0xff]  ;;  %v1312_v58 = vpack.c.bf16 %v321_v52, %v315_v51 }
  0x8d   : > { %1275 = vmatprep.subr.bf16.mxu1 %v1274_v37  ;;  %v1798_v37 = vld [vmem:[%s1749_s9 + $0x48] sm:$0xff]  ;;  %v1302_v38 = vpack.c.bf16 %v298_v32, %v292_v31  ;;  %v327_v59 = vld [vmem:[#allocation5 + $0x2c0] sm:$0xff]  ;;  %v333_v60 = vld [vmem:[#allocation5 + $0x2f0] sm:$0xff] }
  0x8e   : > { %v340_v63 = vld [vmem:[#allocation5 + $0x328] sm:$0xff]  ;;  %v346_v0 = vld [vmem:[#allocation5 + $0x358] sm:$0xff]  ;;  %v345_v4 = vld [vmem:[#allocation5 + $0x350] sm:$0xff] }
  0x8f   : > { %1213 = vmatpush1.bf16.msra.mxu0 %v1212_v43  ;;  %v303_v43 = vld [vmem:[#allocation5 + $0x200] sm:$0xff]  ;;  %v1838_v5 = vld [vmem:[%s1749_s9 + $0x88] sm:$0xff]  ;;  %v1318_v6 = vpack.c.bf16 %v346_v0, %v340_v63  ;;  %v357_v14 = vld [vmem:[#allocation5 + $0x3b0] sm:$0xff] }
  0x90   : > { %1277 = vmatpush1.bf16.msra.mxu1 %v1276_v44  ;;  %1215 = vmatprep.subr.bf16.mxu0 %v1214_v45  ;;  %v309_v44 = vld [vmem:[#allocation5 + $0x230] sm:$0xff]  ;;  %v1808_v45 = vld [vmem:[%s1749_s9 + $0x58] sm:$0xff]  ;;  %v352_v7 = vld [vmem:[#allocation5 + $0x388] sm:$0xff] }
  0x91   : > { %1279 = vmatprep.subr.bf16.mxu1 %v1278_v49  ;;  %v1813_v49 = vld [vmem:[%s1749_s9 + $0x50] sm:$0xff]  ;;  %v1308_v50 = vpack.c.bf16 %v309_v44, %v303_v43  ;;  %v1843_v10 = vld [vmem:[%s1749_s9 + $0x80] sm:$0xff]  ;;  %v1848_v15 = vld [vmem:[%s1749_s9 + $0x98] sm:$0xff] }
  0x92   : > { %v364_v19 = vld [vmem:[#allocation5 + $0x3e8] sm:$0xff]  ;;  %v370_v20 = vld [vmem:[#allocation5 + $0x418] sm:$0xff]  ;;  %v363_v24 = vld [vmem:[#allocation5 + $0x3e0] sm:$0xff] }
  0x93   : > { %1217 = vmatpush1.bf16.msra.mxu0 %v1216_v55  ;;  %v328_v55 = vld [vmem:[#allocation5 + $0x2c8] sm:$0xff]  ;;  %v1326_v28 = vpack.c.bf16 %v370_v20, %v364_v19  ;;  %v382_v31 = vld [vmem:[#allocation5 + $0x478] sm:$0xff]  ;;  %v1863_v32 = vld [vmem:[%s1749_s9 + $0xa0] sm:$0xff] }
  0x94   : > { %1281 = vmatpush1.bf16.msra.mxu1 %v1280_v56  ;;  %1219 = vmatprep.subr.bf16.mxu0 %v1218_v57  ;;  %v334_v56 = vld [vmem:[#allocation5 + $0x2f8] sm:$0xff]  ;;  %v1823_v57 = vld [vmem:[%s1749_s9 + $0x60] sm:$0xff]  ;;  %v1858_v27 = vld [vmem:[%s1749_s9 + $0xa8] sm:$0xff] }
  0x95   : > { %1283 = vmatprep.subr.bf16.mxu1 %v1282_v61  ;;  %v1828_v61 = vld [vmem:[%s1749_s9 + $0x78] sm:$0xff]  ;;  %v1314_v62 = vpack.c.bf16 %v334_v56, %v328_v55  ;;  %v375_v35 = vld [vmem:[#allocation5 + $0x440] sm:$0xff]  ;;  %v381_v36 = vld [vmem:[#allocation5 + $0x470] sm:$0xff] }
  0x96   : > { %v388_v40 = vld [vmem:[#allocation5 + $0x4a8] sm:$0xff]  ;;  %v1873_v43 = vld [vmem:[%s1749_s9 + $0xb0] sm:$0xff]  ;;  %v1332_v44 = vpack.c.bf16 %v381_v36, %v375_v35  ;;  %v406_v52 = vld [vmem:[#allocation5 + $0x538] sm:$0xff] }
  0x97   : > { %1221 = vmatpush1.bf16.msra.mxu0 %v1220_v1  ;;  %v1833_v1 = vld [vmem:[%s1749_s9 + $0x70] sm:$0xff]  ;;  %v1878_v48 = vld [vmem:[%s1749_s9 + $0xc8] sm:$0xff]  ;;  %v399_v56 = vld [vmem:[#allocation5 + $0x500] sm:$0xff] }
  0x98   : > { %1285 = vmatpush1.bf16.msra.mxu1 %v1284_v2  ;;  %1287 = vmatprep.subr.bf16.mxu0 %v1286_v3  ;;  %v1316_v2 = vpack.c.bf16 %v333_v60, %v327_v59  ;;  %v393_v47 = vld [vmem:[#allocation5 + $0x4d0] sm:$0xff]  ;;  %v400_v51 = vld [vmem:[#allocation5 + $0x508] sm:$0xff]  ;;  %v1888_v59 = vld [vmem:[%s1749_s9 + $0xd8] sm:$0xff] }
  0x99   : > { %1350 = vmatprep.subr.bf16.mxu1 %v1286_v3  ;;  %v339_v3 = vld [vmem:[#allocation5 + $0x320] sm:$0xff]  ;;  %v1338_v60 = vpack.c.bf16 %v406_v52, %v400_v51  ;;  %v418_v63 = vld [vmem:[#allocation5 + $0x598] sm:$0xff]  ;;  %v1893_v0 = vld [vmem:[%s1749_s9 + $0xd0] sm:$0xff] }
  0x9a   : > { %528 = vmatmul.mubr.f32.vlgmr.msra.gmra.mrb[0].mxu0 %v1765_v8  ;;  %v1320_v11 = vpack.c.bf16 %v345_v4, %v339_v3  ;;  %v411_v3 = vld [vmem:[#allocation5 + $0x560] sm:$0xff]  ;;  %v417_v4 = vld [vmem:[#allocation5 + $0x590] sm:$0xff]  ;;  %v238_v20 = vld [vmem:[%s1749_s9 + $0xf8] sm:$0xff] }
  0x9b   : > { %689 = vmatmul.mubr.f32.vlgmr.msra.gmra.mrb[0].mxu1 %v1765_v8  ;;  %1289 = vmatpush1.bf16.msra.mxu0 %v1288_v9  ;;  %v429_v19 = vld [vmem:[#allocation5 + $0x5f0] sm:$0xff] }
  0x9c   : > { %1366 = vmatpush1.bf16.msra.mxu1 %v1288_v9  ;;  %533 = vmatprep.mubr.f32.mxu0 %v1768_v12  ;;  %v358_v9 = vld [vmem:[#allocation5 + $0x3b8] sm:$0xff] }
  0x9d   : > { %694 = vmatprep.mubr.f32.mxu1 %v1768_v12  ;;  %1291 = vmatprep.subr.bf16.mxu0 %v1290_v13 }
  0x9e   : > { %534 = vmatmul.mubr.f32.gmra.mrb[2].mxu0 %v1773_v17  ;;  %1351 = vmatprep.subr.bf16.mxu1 %v1290_v13  ;;  %v351_v13 = vld [vmem:[#allocation5 + $0x380] sm:$0xff] }
  0x9f   : > { %695 = vmatmul.mubr.f32.gmra.mrb[2].mxu1 %v1773_v17  ;;  %1293 = vmatpush1.bf16.msra.mxu0 %v1292_v18  ;;  %v1324_v23 = vpack.c.bf16 %v357_v14, %v351_v13  ;;  %v235_v13 = vld [vmem:[%s1749_s9 + $0xe0] sm:$0xff]  ;;  %v1344_v14 = vpack.c.bf16 %v417_v4, %v411_v3 }
  0xa0   : > { %1367 = vmatpush1.bf16.msra.mxu1 %v1292_v18  ;;  %539 = vmatprep.mubr.f32.mxu0 %v1778_v21  ;;  %v1322_v18 = vpack.c.bf16 %v358_v9, %v352_v7  ;;  %v424_v9 = vld [vmem:[#allocation5 + $0x5c8] sm:$0xff] }
  0xa1   : > { %700 = vmatprep.mubr.f32.mxu1 %v1778_v21  ;;  %1295 = vmatprep.subr.bf16.mxu0 %v1294_v22 }
  0xa2   : > { %540 = vmatmul.mubr.f32.gmra.mrb[4].mxu0 %v1783_v25  ;;  %1352 = vmatprep.subr.bf16.mxu1 %v1294_v22  ;;  %v1853_v22 = vld [vmem:[%s1749_s9 + $0x90] sm:$0xff] }
  0xa3   : > { %701 = vmatmul.mubr.f32.gmra.mrb[4].mxu1 %v1783_v25  ;;  %1297 = vmatpush1.bf16.msra.mxu0 %v1296_v26 }
  0xa4   : > { %1368 = vmatpush1.bf16.msra.mxu1 %v1296_v26  ;;  %545 = vmatprep.mubr.f32.mxu0 %v1788_v29  ;;  %v369_v26 = vld [vmem:[#allocation5 + $0x410] sm:$0xff] }
  0xa5   : > { %706 = vmatprep.mubr.f32.mxu1 %v1788_v29  ;;  %1299 = vmatprep.subr.bf16.mxu0 %v1298_v30 }
  0xa6   : > { %546 = vmatmul.mubr.f32.gmra.mrb[6].mxu0 %v1793_v33  ;;  %1353 = vmatprep.subr.bf16.mxu1 %v1298_v30  ;;  %v376_v30 = vld [vmem:[#allocation5 + $0x448] sm:$0xff] }
  0xa7   : > { %707 = vmatmul.mubr.f32.gmra.mrb[6].mxu1 %v1793_v33  ;;  %1301 = vmatpush1.bf16.msra.mxu0 %v1300_v34  ;;  %v1330_v39 = vpack.c.bf16 %v382_v31, %v376_v30 }
  0xa8   : > { %1369 = vmatpush1.bf16.msra.mxu1 %v1300_v34  ;;  %551 = vmatprep.mubr.f32.mxu0 %v1798_v37  ;;  %v1328_v34 = vpack.c.bf16 %v369_v26, %v363_v24  ;;  %v237_v24 = vld [vmem:[%s1749_s9 + $0xf0] sm:$0xff] }
  0xa9   : > { %712 = vmatprep.mubr.f32.mxu1 %v1798_v37  ;;  %1303 = vmatprep.subr.bf16.mxu0 %v1302_v38 }
  0xaa   : > { %552 = vmatmul.mubr.f32.gmra.mrb[8].mxu0 %v1803_v41  ;;  %1354 = vmatprep.subr.bf16.mxu1 %v1302_v38  ;;  %v1868_v38 = vld [vmem:[%s1749_s9 + $0xb8] sm:$0xff] }
  0xab   : > { %713 = vmatmul.mubr.f32.gmra.mrb[8].mxu1 %v1803_v41  ;;  %1305 = vmatpush1.bf16.msra.mxu0 %v1304_v42 }
  0xac   : > { %1370 = vmatpush1.bf16.msra.mxu1 %v1304_v42  ;;  %557 = vmatprep.mubr.f32.mxu0 %v1808_v45  ;;  %v394_v42 = vld [vmem:[#allocation5 + $0x4d8] sm:$0xff] }
  0xad   : > { %718 = vmatprep.mubr.f32.mxu1 %v1808_v45  ;;  %1307 = vmatprep.subr.bf16.mxu0 %v1306_v46 }
  0xae   : > { %558 = vmatmul.mubr.f32.gmra.mrb[10].mxu0 %v1813_v49  ;;  %1355 = vmatprep.subr.bf16.mxu1 %v1306_v46  ;;  %v387_v46 = vld [vmem:[#allocation5 + $0x4a0] sm:$0xff] }
  0xaf   : > { %719 = vmatmul.mubr.f32.gmra.mrb[10].mxu1 %v1813_v49  ;;  %1309 = vmatpush1.bf16.msra.mxu0 %v1308_v50  ;;  %v1336_v55 = vpack.c.bf16 %v393_v47, %v387_v46 }
  0xb0   : > { %1371 = vmatpush1.bf16.msra.mxu1 %v1308_v50  ;;  %563 = vmatprep.mubr.f32.mxu0 %v1818_v53  ;;  %v1334_v50 = vpack.c.bf16 %v394_v42, %v388_v40 }
  0xb1   : > { %724 = vmatprep.mubr.f32.mxu1 %v1818_v53  ;;  %1311 = vmatprep.subr.bf16.mxu0 %v1310_v54 }
  0xb2   : > { %564 = vmatmul.mubr.f32.gmra.mrb[12].mxu0 %v1823_v57  ;;  %1356 = vmatprep.subr.bf16.mxu1 %v1310_v54  ;;  %v1883_v54 = vld [vmem:[%s1749_s9 + $0xc0] sm:$0xff] }
  0xb3   : > { %725 = vmatmul.mubr.f32.gmra.mrb[12].mxu1 %v1823_v57  ;;  %1313 = vmatpush1.bf16.msra.mxu0 %v1312_v58 }
  0xb4   : > { %1372 = vmatpush1.bf16.msra.mxu1 %v1312_v58  ;;  %569 = vmatprep.mubr.f32.mxu0 %v1828_v61  ;;  %v405_v58 = vld [vmem:[#allocation5 + $0x530] sm:$0xff] }
  0xb5   : > { %730 = vmatprep.mubr.f32.mxu1 %v1828_v61  ;;  %1315 = vmatprep.subr.bf16.mxu0 %v1314_v62 }
  0xb6   : > { %570 = vmatmul.mubr.f32.gmra.mrb[14].mxu0 %v1833_v1  ;;  %1357 = vmatprep.subr.bf16.mxu1 %v1314_v62  ;;  %v412_v62 = vld [vmem:[#allocation5 + $0x568] sm:$0xff] }
  0xb7   : > { %731 = vmatmul.mubr.f32.gmra.mrb[14].mxu1 %v1833_v1  ;;  %1317 = vmatpush1.bf16.msra.mxu0 %v1316_v2  ;;  %v1342_v7 = vpack.c.bf16 %v418_v63, %v412_v62 }
  0xb8   : > { %1373 = vmatpush1.bf16.msra.mxu1 %v1316_v2  ;;  %575 = vmatprep.mubr.f32.mxu0 %v1838_v5  ;;  %v1340_v2 = vpack.c.bf16 %v405_v58, %v399_v56 }
  0xb9   : > { %736 = vmatprep.mubr.f32.mxu1 %v1838_v5  ;;  %1319 = vmatprep.subr.bf16.mxu0 %v1318_v6 }
  0xba   : > { %576 = vmatmul.mubr.f32.gmra.mrb[16].mxu0 %v1843_v10  ;;  %1358 = vmatprep.subr.bf16.mxu1 %v1318_v6  ;;  %v236_v6 = vld [vmem:[%s1749_s9 + $0xe8] sm:$0xff] }
  0xbb   : > { %737 = vmatmul.mubr.f32.gmra.mrb[16].mxu1 %v1843_v10  ;;  %1321 = vmatpush1.bf16.msra.mxu0 %v1320_v11 }
  0xbc   : > { %1374 = vmatpush1.bf16.msra.mxu1 %v1320_v11  ;;  %581 = vmatprep.mubr.f32.mxu0 %v1848_v15  ;;  %v430_v11 = vld [vmem:[#allocation5 + $0x5f8] sm:$0xff] }
  0xbd   : > { %742 = vmatprep.mubr.f32.mxu1 %v1848_v15  ;;  %1323 = vmatprep.subr.bf16.mxu0 %v1322_v18 }
  0xbe   : > { %582 = vmatmul.mubr.f32.gmra.mrb[18].mxu0 %v1853_v22  ;;  %1359 = vmatprep.subr.bf16.mxu1 %v1322_v18  ;;  %v423_v18 = vld [vmem:[#allocation5 + $0x5c0] sm:$0xff] }
  0xbf   : > { %743 = vmatmul.mubr.f32.gmra.mrb[18].mxu1 %v1853_v22  ;;  %1325 = vmatpush1.bf16.msra.mxu0 %v1324_v23  ;;  %v1348_v26 = vpack.c.bf16 %v429_v19, %v423_v18 }
  0xc0   : > { %1375 = vmatpush1.bf16.msra.mxu1 %v1324_v23  ;;  %587 = vmatprep.mubr.f32.mxu0 %v1858_v27  ;;  %v1346_v23 = vpack.c.bf16 %v430_v11, %v424_v9 }
  0xc1   : > { %748 = vmatprep.mubr.f32.mxu1 %v1858_v27  ;;  %1327 = vmatprep.subr.bf16.mxu0 %v1326_v28 }
  0xc2   : > { %588 = vmatmul.mubr.f32.gmra.mrb[20].mxu0 %v1863_v32  ;;  %1360 = vmatprep.subr.bf16.mxu1 %v1326_v28 }
  0xc3   : > { %749 = vmatmul.mubr.f32.gmra.mrb[20].mxu1 %v1863_v32  ;;  %1329 = vmatpush1.bf16.msra.mxu0 %v1328_v34 }
  0xc4   : > { %1376 = vmatpush1.bf16.msra.mxu1 %v1328_v34  ;;  %593 = vmatprep.mubr.f32.mxu0 %v1868_v38 }
  0xc5   : > { %754 = vmatprep.mubr.f32.mxu1 %v1868_v38  ;;  %1331 = vmatprep.subr.bf16.mxu0 %v1330_v39 }
  0xc6   : > { %594 = vmatmul.mubr.f32.gmra.mrb[22].mxu0 %v1873_v43  ;;  %1361 = vmatprep.subr.bf16.mxu1 %v1330_v39 }
  0xc7   : > { %755 = vmatmul.mubr.f32.gmra.mrb[22].mxu1 %v1873_v43  ;;  %1333 = vmatpush1.bf16.msra.mxu0 %v1332_v44 }
  0xc8   : > { %1377 = vmatpush1.bf16.msra.mxu1 %v1332_v44  ;;  %599 = vmatprep.mubr.f32.mxu0 %v1878_v48 }
  0xc9   : > { %760 = vmatprep.mubr.f32.mxu1 %v1878_v48  ;;  %1335 = vmatprep.subr.bf16.mxu0 %v1334_v50 }
  0xca   : > { %600 = vmatmul.mubr.f32.gmra.mrb[24].mxu0 %v1883_v54  ;;  %1362 = vmatprep.subr.bf16.mxu1 %v1334_v50 }
  0xcb   : > { %761 = vmatmul.mubr.f32.gmra.mrb[24].mxu1 %v1883_v54  ;;  %1337 = vmatpush1.bf16.msra.mxu0 %v1336_v55 }
  0xcc   : > { %1378 = vmatpush1.bf16.msra.mxu1 %v1336_v55  ;;  %605 = vmatprep.mubr.f32.mxu0 %v1888_v59 }
  0xcd   : > { %766 = vmatprep.mubr.f32.mxu1 %v1888_v59  ;;  %1339 = vmatprep.subr.bf16.mxu0 %v1338_v60 }
  0xce   : > { %606 = vmatmul.mubr.f32.gmra.mrb[26].mxu0 %v1893_v0  ;;  %1363 = vmatprep.subr.bf16.mxu1 %v1338_v60 }
  0xcf   : > { %767 = vmatmul.mubr.f32.gmra.mrb[26].mxu1 %v1893_v0  ;;  %1341 = vmatpush1.bf16.msra.mxu0 %v1340_v2 }
  0xd0   : > { %1379 = vmatpush1.bf16.msra.mxu1 %v1340_v2  ;;  %611 = vmatprep.mubr.f32.mxu0 %v236_v6 }
  0xd1   : > { %772 = vmatprep.mubr.f32.mxu1 %v236_v6  ;;  %1343 = vmatprep.subr.bf16.mxu0 %v1342_v7 }
  0xd2   : > { %612 = vmatmul.mubr.f32.gmra.mrb[28].mxu0 %v235_v13  ;;  %1364 = vmatprep.subr.bf16.mxu1 %v1342_v7 }
  0xd3   : > { %773 = vmatmul.mubr.f32.gmra.mrb[28].mxu1 %v235_v13  ;;  %1345 = vmatpush1.bf16.msra.mxu0 %v1344_v14 }
  0xd4   : > { %1380 = vmatpush1.bf16.msra.mxu1 %v1344_v14  ;;  %617 = vmatprep.mubr.f32.mxu0 %v238_v20 }
  0xd5   : > { %778 = vmatprep.mubr.f32.mxu1 %v238_v20  ;;  %1347 = vmatprep.subr.bf16.mxu0 %v1346_v23 }
  0xd6   : > { %618 = vmatmul.mubr.f32.gmra.mrb[30].mxu0 %v237_v24  ;;  %1365 = vmatprep.subr.bf16.mxu1 %v1346_v23 }
  0xd7   : > { %779 = vmatmul.mubr.f32.gmra.mrb[30].mxu1 %v237_v24  ;;  %1349 = vmatpush1.bf16.msra.mxu0 %v1348_v26 }
  0xd8   : > { %1381 = vmatpush1.bf16.msra.mxu1 %v1348_v26  ;;  %849 = vmatprep.mubr.f32.mxu0 %v1760_v16  ;;  %v433_v16 = vlaneseq }
  0xd9   : > { %897 = vmatprep.mubr.f32.mxu1 %v1838_v5 }
  0xda   : > { %850 = vmatmul.mubr.f32.vlgmr.msra.gmra.mrb[32].mxu0 %v1765_v8  ;;  %v1931_v8 = vshrl.u32 %v433_v16, 7 }
  0xdb   : > { %898 = vmatmul.mubr.f32.vlgmr.msra.gmra.mrb[32].mxu1 %v1843_v10  ;;  %855 = vmatprep.mubr.f32.mxu0 %v1768_v12 }
  0xdc   : > { %903 = vmatprep.mubr.f32.mxu1 %v1848_v15  ;;  %v435_v12 = vsub.s32 0, %v1931_v8 }
  0xde   : > { %856 = vmatmul.mubr.f32.gmra.mrb[34].mxu0 %v1773_v17  ;;  %v1937_v17 = vld [vmem:[%s2210_s2] sm:$0x3f] }
  0xdf   : > { %904 = vmatmul.mubr.f32.gmra.mrb[34].mxu1 %v1853_v22  ;;  %861 = vmatprep.mubr.f32.mxu0 %v1778_v21  ;;  %v443_v21 = vsub.s32 2, %v1931_v8 }
  0xe0   : > { %909 = vmatprep.mubr.f32.mxu1 %v1858_v27 }
  0xe2   : > { %862 = vmatmul.mubr.f32.gmra.mrb[36].mxu0 %v1783_v25  ;;  %v439_v25 = vsub.s32 1, %v1931_v8 }
  0xe3   : > { %910 = vmatmul.mubr.f32.gmra.mrb[36].mxu1 %v1863_v32  ;;  %867 = vmatprep.mubr.f32.mxu0 %v1788_v29  ;;  %v447_v29 = vsub.s32 3, %v1931_v8 }
  0xe4   : > { %915 = vmatprep.mubr.f32.mxu1 %v1868_v38 }
  0xe6   : > { %868 = vmatmul.mubr.f32.gmra.mrb[38].mxu0 %v1793_v33  ;;  %v1944_v33 = vrot.slane %v1937_v17, %v435_v12 }
  0xe7   : > { %916 = vmatmul.mubr.f32.gmra.mrb[38].mxu1 %v1873_v43  ;;  %873 = vmatprep.mubr.f32.mxu0 %v1798_v37  ;;  %v1947_v37 = vrot.slane %v1937_v17, %v443_v21 }
  0xe8   : > { %921 = vmatprep.mubr.f32.mxu1 %v1878_v48 }
  0xea   : > { %874 = vmatmul.mubr.f32.gmra.mrb[40].mxu0 %v1803_v41  ;;  %v1950_v41 = vrot.slane %v1937_v17, %v439_v25 }
  0xeb   : > { %922 = vmatmul.mubr.f32.gmra.mrb[40].mxu1 %v1883_v54  ;;  %879 = vmatprep.mubr.f32.mxu0 %v1808_v45  ;;  %v1953_v45 = vrot.slane %v1937_v17, %v447_v29 }
  0xec   : > { %927 = vmatprep.mubr.f32.mxu1 %v1888_v59 }
  0xee   : > { %880 = vmatmul.mubr.f32.gmra.mrb[42].mxu0 %v1813_v49 }
  0xef   : > { %928 = vmatmul.mubr.f32.gmra.mrb[42].mxu1 %v1893_v0  ;;  %885 = vmatprep.mubr.f32.mxu0 %v1818_v53 }
  0xf0   : > { %933 = vmatprep.mubr.f32.mxu1 %v236_v6 }
  0xf2   : > { %886 = vmatmul.mubr.f32.gmra.mrb[44].mxu0 %v1823_v57 }
  0xf3   : > { %934 = vmatmul.mubr.f32.gmra.mrb[44].mxu1 %v235_v13  ;;  %891 = vmatprep.mubr.f32.mxu0 %v1828_v61 }
  0xf4   : > { %939 = vmatprep.mubr.f32.mxu1 %v238_v20 }
  0xf6   : > { %892 = vmatmul.mubr.f32.gmra.mrb[46].mxu0 %v1833_v1 }
  0xf7   : > { %940 = vmatmul.mubr.f32.gmra.mrb[46].mxu1 %v237_v24 }
 0x16d   : > { %v529_v49 = vpop.f32.mrb[0].mxu0 }
 0x16e   : > { %v530_v53 = vadd.f32 %v529_v49, %v1944_v33  ;;  %v690_v57 = vpop.f32.mrb[0].mxu1  ;;  %v531_v61 = vpop.f32.mrb[1].mxu0 }
 0x16f   : > { %v691_v1 = vadd.f32 %v690_v57, %v1947_v37  ;;  %v532_v5 = vadd.f32 %v531_v61, %v1950_v41  ;;  %v692_v10 = vpop.f32.mrb[1].mxu1 }
 0x170   : > { %946 = vst [vmem:[%s1958_s25] sm:$0xff] %v530_v53  ;;  %v693_v15 = vadd.f32 %v692_v10, %v1953_v45 }
 0x171   : > { %948 = vst [vmem:[%s1958_s25 + $0x10] sm:$0xff] %v691_v1  ;;  %947 = vst [vmem:[%s1958_s25 + $0x8] sm:$0xff] %v532_v5  ;;  %v535_v22 = vpop.f32.mrb[2].mxu0 }
 0x172   : > { %949 = vst [vmem:[%s1958_s25 + $0x18] sm:$0xff] %v693_v15  ;;  %v536_v27 = vadd.f32 %v535_v22, %v1944_v33  ;;  %v696_v28 = vpop.f32.mrb[2].mxu1  ;;  %v537_v30 = vpop.f32.mrb[3].mxu0 }
 0x173   : > { %v697_v31 = vadd.f32 %v696_v28, %v1947_v37  ;;  %v538_v32 = vadd.f32 %v537_v30, %v1950_v41  ;;  %v698_v34 = vpop.f32.mrb[3].mxu1 }
 0x174   : > { %952 = vst [vmem:[%s1958_s25 + $0x30] sm:$0xff] %v536_v27  ;;  %v699_v35 = vadd.f32 %v698_v34, %v1953_v45 }
 0x175   : > { %954 = vst [vmem:[%s1958_s25 + $0x40] sm:$0xff] %v697_v31  ;;  %953 = vst [vmem:[%s1958_s25 + $0x38] sm:$0xff] %v538_v32  ;;  %v541_v36 = vpop.f32.mrb[4].mxu0 }
 0x176   : > { %955 = vst [vmem:[%s1958_s25 + $0x48] sm:$0xff] %v699_v35  ;;  %v542_v38 = vadd.f32 %v541_v36, %v1944_v33  ;;  %v702_v39 = vpop.f32.mrb[4].mxu1  ;;  %v543_v40 = vpop.f32.mrb[5].mxu0 }
 0x177   : > { %v703_v42 = vadd.f32 %v702_v39, %v1947_v37  ;;  %v544_v43 = vadd.f32 %v543_v40, %v1950_v41  ;;  %v704_v44 = vpop.f32.mrb[5].mxu1 }
 0x178   : > { %958 = vst [vmem:[%s1958_s25 + $0x60] sm:$0xff] %v542_v38  ;;  %v705_v46 = vadd.f32 %v704_v44, %v1953_v45 }
 0x179   : > { %960 = vst [vmem:[%s1958_s25 + $0x70] sm:$0xff] %v703_v42  ;;  %959 = vst [vmem:[%s1958_s25 + $0x68] sm:$0xff] %v544_v43  ;;  %v547_v47 = vpop.f32.mrb[6].mxu0 }
 0x17a   : > { %961 = vst [vmem:[%s1958_s25 + $0x78] sm:$0xff] %v705_v46  ;;  %v548_v48 = vadd.f32 %v547_v47, %v1944_v33  ;;  %v708_v50 = vpop.f32.mrb[6].mxu1  ;;  %v549_v51 = vpop.f32.mrb[7].mxu0 }
 0x17b   : > { %v709_v52 = vadd.f32 %v708_v50, %v1947_v37  ;;  %v550_v54 = vadd.f32 %v549_v51, %v1950_v41  ;;  %v710_v55 = vpop.f32.mrb[7].mxu1 }
 0x17c   : > { %964 = vst [vmem:[%s1958_s25 + $0x90] sm:$0xff] %v548_v48  ;;  %v711_v56 = vadd.f32 %v710_v55, %v1953_v45 }
 0x17d   : > { %966 = vst [vmem:[%s1958_s25 + $0xa0] sm:$0xff] %v709_v52  ;;  %965 = vst [vmem:[%s1958_s25 + $0x98] sm:$0xff] %v550_v54  ;;  %v553_v58 = vpop.f32.mrb[8].mxu0 }
 0x17e   : > { %967 = vst [vmem:[%s1958_s25 + $0xa8] sm:$0xff] %v711_v56  ;;  %v554_v59 = vadd.f32 %v553_v58, %v1944_v33  ;;  %v714_v60 = vpop.f32.mrb[8].mxu1  ;;  %v555_v62 = vpop.f32.mrb[9].mxu0 }
 0x17f   : > { %v715_v63 = vadd.f32 %v714_v60, %v1947_v37  ;;  %v556_v0 = vadd.f32 %v555_v62, %v1950_v41  ;;  %v716_v2 = vpop.f32.mrb[9].mxu1 }
 0x180   : > { %970 = vst [vmem:[%s1958_s25 + $0xc0] sm:$0xff] %v554_v59  ;;  %v717_v3 = vadd.f32 %v716_v2, %v1953_v45 }
 0x181   : > { %972 = vst [vmem:[%s1958_s25 + $0xd0] sm:$0xff] %v715_v63  ;;  %971 = vst [vmem:[%s1958_s25 + $0xc8] sm:$0xff] %v556_v0  ;;  %v559_v4 = vpop.f32.mrb[10].mxu0 }
 0x182   : > { %973 = vst [vmem:[%s1958_s25 + $0xd8] sm:$0xff] %v717_v3  ;;  %v560_v6 = vadd.f32 %v559_v4, %v1944_v33  ;;  %v720_v7 = vpop.f32.mrb[10].mxu1  ;;  %v561_v9 = vpop.f32.mrb[11].mxu0 }
 0x183   : > { %v721_v11 = vadd.f32 %v720_v7, %v1947_v37  ;;  %v562_v13 = vadd.f32 %v561_v9, %v1950_v41  ;;  %v722_v14 = vpop.f32.mrb[11].mxu1 }
 0x184   : > { %976 = vst [vmem:[%s1958_s25 + $0xf0] sm:$0xff] %v560_v6  ;;  %v723_v18 = vadd.f32 %v722_v14, %v1953_v45 }
 0x185   : > { %978 = vst [vmem:[%s1958_s25 + $0x100] sm:$0xff] %v721_v11  ;;  %977 = vst [vmem:[%s1958_s25 + $0xf8] sm:$0xff] %v562_v13  ;;  %v565_v19 = vpop.f32.mrb[12].mxu0 }
 0x186   : > { %979 = vst [vmem:[%s1958_s25 + $0x108] sm:$0xff] %v723_v18  ;;  %v566_v20 = vadd.f32 %v565_v19, %v1944_v33  ;;  %v726_v23 = vpop.f32.mrb[12].mxu1  ;;  %v567_v24 = vpop.f32.mrb[13].mxu0 }
 0x187   : > { %v727_v26 = vadd.f32 %v726_v23, %v1947_v37  ;;  %v568_v16 = vadd.f32 %v567_v24, %v1950_v41  ;;  %v728_v12 = vpop.f32.mrb[13].mxu1 }
 0x188   : > { %982 = vst [vmem:[%s1958_s25 + $0x120] sm:$0xff] %v566_v20  ;;  %v729_v21 = vadd.f32 %v728_v12, %v1953_v45 }
 0x189   : > { %984 = vst [vmem:[%s1958_s25 + $0x130] sm:$0xff] %v727_v26  ;;  %983 = vst [vmem:[%s1958_s25 + $0x128] sm:$0xff] %v568_v16  ;;  %v571_v25 = vpop.f32.mrb[14].mxu0 }
 0x18a   : > { %985 = vst [vmem:[%s1958_s25 + $0x138] sm:$0xff] %v729_v21  ;;  %v572_v29 = vadd.f32 %v571_v25, %v1944_v33  ;;  %v732_v49 = vpop.f32.mrb[14].mxu1  ;;  %v573_v53 = vpop.f32.mrb[15].mxu0 }
 0x18b   : > { %v733_v57 = vadd.f32 %v732_v49, %v1947_v37  ;;  %v574_v61 = vadd.f32 %v573_v53, %v1950_v41  ;;  %v734_v1 = vpop.f32.mrb[15].mxu1  ;;  %v451_v49 = vsub.s32 4, %v1931_v8 }
 0x18c   : > { %988 = vst [vmem:[%s1958_s25 + $0x150] sm:$0xff] %v572_v29  ;;  %v735_v5 = vadd.f32 %v734_v1, %v1953_v45  ;;  %v455_v1 = vsub.s32 5, %v1931_v8 }
 0x18d   : > { %990 = vst [vmem:[%s1958_s25 + $0x160] sm:$0xff] %v733_v57  ;;  %989 = vst [vmem:[%s1958_s25 + $0x158] sm:$0xff] %v574_v61  ;;  %v577_v10 = vpop.f32.mrb[16].mxu0 }
 0x18e   : > { %991 = vst [vmem:[%s1958_s25 + $0x168] sm:$0xff] %v735_v5  ;;  %v578_v15 = vadd.f32 %v577_v10, %v1944_v33  ;;  %v738_v22 = vpop.f32.mrb[16].mxu1  ;;  %v579_v27 = vpop.f32.mrb[17].mxu0 }
 0x18f   : > { %v739_v28 = vadd.f32 %v738_v22, %v1947_v37  ;;  %v580_v30 = vadd.f32 %v579_v27, %v1950_v41  ;;  %v740_v31 = vpop.f32.mrb[17].mxu1 }
 0x190   : > { %994 = vst [vmem:[%s1958_s25 + $0x180] sm:$0xff] %v578_v15  ;;  %v741_v32 = vadd.f32 %v740_v31, %v1953_v45 }
 0x191   : > { %996 = vst [vmem:[%s1958_s25 + $0x190] sm:$0xff] %v739_v28  ;;  %995 = vst [vmem:[%s1958_s25 + $0x188] sm:$0xff] %v580_v30  ;;  %v583_v34 = vpop.f32.mrb[18].mxu0  ;;  %v2081_v28 = vrot.slane %v1937_v17, %v451_v49 }
 0x192   : > { %997 = vst [vmem:[%s1958_s25 + $0x198] sm:$0xff] %v741_v32  ;;  %v584_v35 = vadd.f32 %v583_v34, %v1944_v33  ;;  %v744_v36 = vpop.f32.mrb[18].mxu1  ;;  %v585_v38 = vpop.f32.mrb[19].mxu0  ;;  %v2086_v32 = vrot.slane %v1937_v17, %v455_v1 }
 0x193   : > { %v745_v39 = vadd.f32 %v744_v36, %v1947_v37  ;;  %v586_v40 = vadd.f32 %v585_v38, %v1950_v41  ;;  %v746_v42 = vpop.f32.mrb[19].mxu1 }
 0x194   : > { %1000 = vst [vmem:[%s1958_s25 + $0x1b0] sm:$0xff] %v584_v35  ;;  %v747_v43 = vadd.f32 %v746_v42, %v1953_v45 }
 0x195   : > { %1002 = vst [vmem:[%s1958_s25 + $0x1c0] sm:$0xff] %v745_v39  ;;  %1001 = vst [vmem:[%s1958_s25 + $0x1b8] sm:$0xff] %v586_v40  ;;  %v589_v44 = vpop.f32.mrb[20].mxu0 }
 0x196   : > { %1003 = vst [vmem:[%s1958_s25 + $0x1c8] sm:$0xff] %v747_v43  ;;  %v590_v46 = vadd.f32 %v589_v44, %v1944_v33  ;;  %v750_v47 = vpop.f32.mrb[20].mxu1  ;;  %v591_v48 = vpop.f32.mrb[21].mxu0 }
 0x197   : > { %v751_v50 = vadd.f32 %v750_v47, %v1947_v37  ;;  %v592_v51 = vadd.f32 %v591_v48, %v1950_v41  ;;  %v752_v52 = vpop.f32.mrb[21].mxu1 }
 0x198   : > { %1006 = vst [vmem:[%s1958_s25 + $0x1e0] sm:$0xff] %v590_v46  ;;  %v753_v54 = vadd.f32 %v752_v52, %v1953_v45 }
 0x199   : > { %1008 = vst [vmem:[%s1958_s25 + $0x1f0] sm:$0xff] %v751_v50  ;;  %1007 = vst [vmem:[%s1958_s25 + $0x1e8] sm:$0xff] %v592_v51  ;;  %v595_v55 = vpop.f32.mrb[22].mxu0 }
 0x19a   : > { %1009 = vst [vmem:[%s1958_s25 + $0x1f8] sm:$0xff] %v753_v54  ;;  %v596_v56 = vadd.f32 %v595_v55, %v1944_v33  ;;  %v756_v58 = vpop.f32.mrb[22].mxu1  ;;  %v597_v59 = vpop.f32.mrb[23].mxu0 }
 0x19b   : > { %v757_v60 = vadd.f32 %v756_v58, %v1947_v37  ;;  %v598_v62 = vadd.f32 %v597_v59, %v1950_v41  ;;  %v758_v63 = vpop.f32.mrb[23].mxu1 }
 0x19c   : > { %1012 = vst [vmem:[%s1958_s25 + $0x210] sm:$0xff] %v596_v56  ;;  %v759_v0 = vadd.f32 %v758_v63, %v1953_v45 }
 0x19d   : > { %1014 = vst [vmem:[%s1958_s25 + $0x220] sm:$0xff] %v757_v60  ;;  %1013 = vst [vmem:[%s1958_s25 + $0x218] sm:$0xff] %v598_v62  ;;  %v601_v2 = vpop.f32.mrb[24].mxu0 }
 0x19e   : > { %1015 = vst [vmem:[%s1958_s25 + $0x228] sm:$0xff] %v759_v0  ;;  %v602_v3 = vadd.f32 %v601_v2, %v1944_v33  ;;  %v762_v4 = vpop.f32.mrb[24].mxu1  ;;  %v603_v6 = vpop.f32.mrb[25].mxu0 }
 0x19f   : > { %v763_v7 = vadd.f32 %v762_v4, %v1947_v37  ;;  %v604_v9 = vadd.f32 %v603_v6, %v1950_v41  ;;  %v764_v11 = vpop.f32.mrb[25].mxu1 }
 0x1a0   : > { %1018 = vst [vmem:[%s1958_s25 + $0x240] sm:$0xff] %v602_v3  ;;  %v765_v13 = vadd.f32 %v764_v11, %v1953_v45 }
 0x1a1   : > { %1020 = vst [vmem:[%s1958_s25 + $0x250] sm:$0xff] %v763_v7  ;;  %1019 = vst [vmem:[%s1958_s25 + $0x248] sm:$0xff] %v604_v9  ;;  %v607_v14 = vpop.f32.mrb[26].mxu0 }
 0x1a2   : > { %1021 = vst [vmem:[%s1958_s25 + $0x258] sm:$0xff] %v765_v13  ;;  %v608_v18 = vadd.f32 %v607_v14, %v1944_v33  ;;  %v768_v19 = vpop.f32.mrb[26].mxu1  ;;  %v609_v20 = vpop.f32.mrb[27].mxu0 }
 0x1a3   : > { %v769_v23 = vadd.f32 %v768_v19, %v1947_v37  ;;  %v610_v24 = vadd.f32 %v609_v20, %v1950_v41  ;;  %v770_v26 = vpop.f32.mrb[27].mxu1 }
 0x1a4   : > { %1024 = vst [vmem:[%s1958_s25 + $0x270] sm:$0xff] %v608_v18  ;;  %v771_v16 = vadd.f32 %v770_v26, %v1953_v45 }
 0x1a5   : > { %1026 = vst [vmem:[%s1958_s25 + $0x280] sm:$0xff] %v769_v23  ;;  %1025 = vst [vmem:[%s1958_s25 + $0x278] sm:$0xff] %v610_v24  ;;  %v613_v12 = vpop.f32.mrb[28].mxu0 }
 0x1a6   : > { %1027 = vst [vmem:[%s1958_s25 + $0x288] sm:$0xff] %v771_v16  ;;  %v614_v21 = vadd.f32 %v613_v12, %v1944_v33  ;;  %v774_v25 = vpop.f32.mrb[28].mxu1  ;;  %v615_v29 = vpop.f32.mrb[29].mxu0 }
 0x1a7   : > { %v775_v53 = vadd.f32 %v774_v25, %v1947_v37  ;;  %v616_v57 = vadd.f32 %v615_v29, %v1950_v41  ;;  %v776_v61 = vpop.f32.mrb[29].mxu1 }
 0x1a8   : > { %1030 = vst [vmem:[%s1958_s25 + $0x2a0] sm:$0xff] %v614_v21  ;;  %v777_v5 = vadd.f32 %v776_v61, %v1953_v45 }
 0x1a9   : > { %1032 = vst [vmem:[%s1958_s25 + $0x2b0] sm:$0xff] %v775_v53  ;;  %1031 = vst [vmem:[%s1958_s25 + $0x2a8] sm:$0xff] %v616_v57  ;;  %v619_v10 = vpop.f32.mrb[30].mxu0 }
 0x1aa   : > { %1033 = vst [vmem:[%s1958_s25 + $0x2b8] sm:$0xff] %v777_v5  ;;  %v620_v15 = vadd.f32 %v619_v10, %v1944_v33  ;;  %v780_v22 = vpop.f32.mrb[30].mxu1  ;;  %v621_v27 = vpop.f32.mrb[31].mxu0 }
 0x1ab   : > { %v781_v30 = vadd.f32 %v780_v22, %v1947_v37  ;;  %v622_v8 = vadd.f32 %v621_v27, %v1950_v41  ;;  %v782_v31 = vpop.f32.mrb[31].mxu1 }
 0x1ac   : > { %1036 = vst [vmem:[%s1958_s25 + $0x2d0] sm:$0xff] %v620_v15  ;;  %v783_v34 = vadd.f32 %v782_v31, %v1953_v45 }
 0x1ad   : > { %1038 = vst [vmem:[%s1958_s25 + $0x2e0] sm:$0xff] %v781_v30  ;;  %1037 = vst [vmem:[%s1958_s25 + $0x2d8] sm:$0xff] %v622_v8  ;;  %v851_v33 = vpop.f32.mrb[32].mxu0 }
 0x1ae   : > { %1039 = vst [vmem:[%s1958_s25 + $0x2e8] sm:$0xff] %v783_v34  ;;  %v852_v35 = vadd.f32 %v851_v33, %v2081_v28  ;;  %v899_v37 = vpop.f32.mrb[32].mxu1  ;;  %v853_v36 = vpop.f32.mrb[33].mxu0 }
 0x1af   : > { %v900_v41 = vadd.f32 %v899_v37, %v2081_v28  ;;  %v854_v38 = vadd.f32 %v853_v36, %v2086_v32  ;;  %v901_v17 = vpop.f32.mrb[33].mxu1 }
 0x1b0   : > { %950 = vst [vmem:[%s1958_s25 + $0x20] sm:$0xff] %v852_v35  ;;  %v902_v45 = vadd.f32 %v901_v17, %v2086_v32 }
 0x1b1   : > { %998 = vst [vmem:[%s1958_s25 + $0x1a0] sm:$0xff] %v900_v41  ;;  %951 = vst [vmem:[%s1958_s25 + $0x28] sm:$0xff] %v854_v38  ;;  %v857_v39 = vpop.f32.mrb[34].mxu0 }
 0x1b2   : > { %999 = vst [vmem:[%s1958_s25 + $0x1a8] sm:$0xff] %v902_v45  ;;  %v858_v40 = vadd.f32 %v857_v39, %v2081_v28  ;;  %v905_v42 = vpop.f32.mrb[34].mxu1  ;;  %v859_v43 = vpop.f32.mrb[35].mxu0 }
 0x1b3   : > { %v906_v44 = vadd.f32 %v905_v42, %v2081_v28  ;;  %v860_v46 = vadd.f32 %v859_v43, %v2086_v32  ;;  %v907_v47 = vpop.f32.mrb[35].mxu1 }
 0x1b4   : > { %956 = vst [vmem:[%s1958_s25 + $0x50] sm:$0xff] %v858_v40  ;;  %v908_v48 = vadd.f32 %v907_v47, %v2086_v32 }
 0x1b5   : > { %1004 = vst [vmem:[%s1958_s25 + $0x1d0] sm:$0xff] %v906_v44  ;;  %957 = vst [vmem:[%s1958_s25 + $0x58] sm:$0xff] %v860_v46  ;;  %v863_v50 = vpop.f32.mrb[36].mxu0 }
 0x1b6   : > { %1005 = vst [vmem:[%s1958_s25 + $0x1d8] sm:$0xff] %v908_v48  ;;  %v864_v51 = vadd.f32 %v863_v50, %v2081_v28  ;;  %v911_v52 = vpop.f32.mrb[36].mxu1  ;;  %v865_v54 = vpop.f32.mrb[37].mxu0 }
 0x1b7   : > { %v912_v55 = vadd.f32 %v911_v52, %v2081_v28  ;;  %v866_v56 = vadd.f32 %v865_v54, %v2086_v32  ;;  %v913_v58 = vpop.f32.mrb[37].mxu1 }
 0x1b8   : > { %962 = vst [vmem:[%s1958_s25 + $0x80] sm:$0xff] %v864_v51  ;;  %v914_v59 = vadd.f32 %v913_v58, %v2086_v32 }
 0x1b9   : > { %1010 = vst [vmem:[%s1958_s25 + $0x200] sm:$0xff] %v912_v55  ;;  %963 = vst [vmem:[%s1958_s25 + $0x88] sm:$0xff] %v866_v56  ;;  %v869_v60 = vpop.f32.mrb[38].mxu0 }
 0x1ba   : > { %1011 = vst [vmem:[%s1958_s25 + $0x208] sm:$0xff] %v914_v59  ;;  %v870_v62 = vadd.f32 %v869_v60, %v2081_v28  ;;  %v917_v63 = vpop.f32.mrb[38].mxu1  ;;  %v871_v0 = vpop.f32.mrb[39].mxu0 }
 0x1bb   : > { %v918_v2 = vadd.f32 %v917_v63, %v2081_v28  ;;  %v872_v3 = vadd.f32 %v871_v0, %v2086_v32  ;;  %v919_v4 = vpop.f32.mrb[39].mxu1 }
 0x1bc   : > { %968 = vst [vmem:[%s1958_s25 + $0xb0] sm:$0xff] %v870_v62  ;;  %v920_v6 = vadd.f32 %v919_v4, %v2086_v32 }
 0x1bd   : > { %1016 = vst [vmem:[%s1958_s25 + $0x230] sm:$0xff] %v918_v2  ;;  %969 = vst [vmem:[%s1958_s25 + $0xb8] sm:$0xff] %v872_v3  ;;  %v875_v7 = vpop.f32.mrb[40].mxu0 }
 0x1be   : > { %1017 = vst [vmem:[%s1958_s25 + $0x238] sm:$0xff] %v920_v6  ;;  %v876_v9 = vadd.f32 %v875_v7, %v2081_v28  ;;  %v923_v11 = vpop.f32.mrb[40].mxu1  ;;  %v877_v13 = vpop.f32.mrb[41].mxu0 }
 0x1bf   : > { %v924_v14 = vadd.f32 %v923_v11, %v2081_v28  ;;  %v878_v18 = vadd.f32 %v877_v13, %v2086_v32  ;;  %v925_v19 = vpop.f32.mrb[41].mxu1 }
 0x1c0   : > { %974 = vst [vmem:[%s1958_s25 + $0xe0] sm:$0xff] %v876_v9  ;;  %v926_v20 = vadd.f32 %v925_v19, %v2086_v32 }
 0x1c1   : > { %1022 = vst [vmem:[%s1958_s25 + $0x260] sm:$0xff] %v924_v14  ;;  %975 = vst [vmem:[%s1958_s25 + $0xe8] sm:$0xff] %v878_v18  ;;  %v881_v23 = vpop.f32.mrb[42].mxu0 }
 0x1c2   : > { %1023 = vst [vmem:[%s1958_s25 + $0x268] sm:$0xff] %v926_v20  ;;  %v882_v24 = vadd.f32 %v881_v23, %v2081_v28  ;;  %v929_v26 = vpop.f32.mrb[42].mxu1  ;;  %v883_v16 = vpop.f32.mrb[43].mxu0 }
 0x1c3   : > { %v930_v12 = vadd.f32 %v929_v26, %v2081_v28  ;;  %v884_v21 = vadd.f32 %v883_v16, %v2086_v32  ;;  %v931_v25 = vpop.f32.mrb[43].mxu1 }
 0x1c4   : > { %980 = vst [vmem:[%s1958_s25 + $0x110] sm:$0xff] %v882_v24  ;;  %v932_v29 = vadd.f32 %v931_v25, %v2086_v32 }
 0x1c5   : > { %1028 = vst [vmem:[%s1958_s25 + $0x290] sm:$0xff] %v930_v12  ;;  %981 = vst [vmem:[%s1958_s25 + $0x118] sm:$0xff] %v884_v21  ;;  %v887_v49 = vpop.f32.mrb[44].mxu0 }
 0x1c6   : > { %1029 = vst [vmem:[%s1958_s25 + $0x298] sm:$0xff] %v932_v29  ;;  %v888_v53 = vadd.f32 %v887_v49, %v2081_v28  ;;  %v935_v57 = vpop.f32.mrb[44].mxu1  ;;  %v889_v61 = vpop.f32.mrb[45].mxu0 }
 0x1c7   : > { %v936_v1 = vadd.f32 %v935_v57, %v2081_v28  ;;  %v890_v5 = vadd.f32 %v889_v61, %v2086_v32  ;;  %v937_v10 = vpop.f32.mrb[45].mxu1 }
 0x1c8   : > { %986 = vst [vmem:[%s1958_s25 + $0x140] sm:$0xff] %v888_v53  ;;  %v938_v15 = vadd.f32 %v937_v10, %v2086_v32 }
 0x1c9   : > { %1034 = vst [vmem:[%s1958_s25 + $0x2c0] sm:$0xff] %v936_v1  ;;  %987 = vst [vmem:[%s1958_s25 + $0x148] sm:$0xff] %v890_v5  ;;  %v893_v22 = vpop.f32.mrb[46].mxu0 }
 0x1ca   : > { %1035 = vst [vmem:[%s1958_s25 + $0x2c8] sm:$0xff] %v938_v15  ;;  %v894_v27 = vadd.f32 %v893_v22, %v2081_v28  ;;  %v941_v30 = vpop.f32.mrb[46].mxu1  ;;  %v895_v8 = vpop.f32.mrb[47].mxu0 }
 0x1cb   : > { %v942_v31 = vadd.f32 %v941_v30, %v2081_v28  ;;  %v896_v34 = vadd.f32 %v895_v8, %v2086_v32  ;;  %v943_v33 = vpop.f32.mrb[47].mxu1 }
 0x1cc   : > { %992 = vst [vmem:[%s1958_s25 + $0x170] sm:$0xff] %v894_v27  ;;  %v944_v35 = vadd.f32 %v943_v33, %v2086_v32 }
 0x1cd   : > { %1040 = vst [vmem:[%s1958_s25 + $0x2f0] sm:$0xff] %v942_v31  ;;  %993 = vst [vmem:[%s1958_s25 + $0x178] sm:$0xff] %v896_v34 }
 0x1ce   : > { %1041 = vst [vmem:[%s1958_s25 + $0x2f8] sm:$0xff] %v944_v35 }
 0x1cf   : > { %1518 = shalt.err (!%p1515_p7)
}
 0x1d0   : > { %s1519_s22 = scalar_lea.hbm %s2157_s11, 12288  ;;  %s1523_s9 = scalar_lea.hbm %s2211_s3, 24576 }
 0x1d1   : > { %p1520_p9 = scmp.ne.s32.totalorder %s2157_s11, %s1519_s22  ;;  %p1524_p5 = scmp.lt.u32.totalorder %s2157_s11, %s2211_s3 }
 0x1d2   : > { %p1525_p11 = scmp.lt.u32.totalorder %s1523_s9, %s1519_s22  ;;  %p1527_p4 = scmp.lt.u32.totalorder %s1519_s22, %s2157_s11 }
 0x1d3   : > { %p1521_p2 = pnand %p1520_p9, %p1697_p12 }
 0x1d4   : > { %p1526_p1 = por %p1525_p11, %p1524_p5 }
 0x1d5   : > { %p1522_p0 = pneg %p1521_p2 }
 0x1d6   : > { %p1528_p6 = por %p1527_p4, %p1526_p1 }
 0x1d8   : > { %p1529_p8 = pnand %p1528_p6, %p1522_p0 }
 0x1da   : > { %1532 = shalt.err (!%p1529_p8)
}
 0x1db   : > { %s1584_s4 = smov 768   ;;  %s1585_s25 = smov 48  }
 0x1dc   : > { %1390 = dma.vmem_to_hbm [thread:$0]  (%p1697_p12), %s2159_s5, 12288, %s2157_s11, %s1043_s27, %s1584_s4, %s1584_s4, %s1585_s25  }
 0x1dd PF: > { %s1072_s26 = sand.u32 1, %s1563_s12   ;;  %p2226_p10 = scmp.ne.s32.totalorder %s2216_s19, 0 }
 0x1de   : > { %p2227_p13 = scmp.ge.s32.totalorder %s1575_s15, 2  ;;  %s1073_s16 = scalar_lea.sflag [#allocation4], %s1072_s26 }
 0x1e0   : > { %p1401_p3 = pnand %p2227_p13, %p2226_p10 }
 0x1e2   : > { %1558 = dma.done.wait (!%p1401_p3), %s1073_s16, 12288  }
 0x1e3   : > { %1560 = vsyncadd (!%p1401_p3), %s1073_s16, 4294955008  ;;  %p17_p7 = scmp.ge.s32.totalorder %s1662_s24, 4   ;;  %s2228_s12 = smov %s1567_s13 }
 0x1e4   : > { %s2229_s13 = smov %s1571_s14  ;;  %s2230_s14 = smov %s1693_s17 }
 0x1e5   : > { %s2231_s15 = smov %s1662_s24  ;;  %19 = sbr.rel (!%p17_p7) target bundleno = 6 (0x6), region = 81 }
 0x1ec   :  { %1078 = vsyncpa [#allocation3], 1 }
 0x1ed   :  { %1080 = vsyncpa [#allocation3 + $0x1], 1 }
 0x1ee   :  { %1081 = vsyncpa [#allocation6], 1 }
 0x1ef   :  { %1082 = vsyncpa [#allocation4], 1 }
 0x1f0   :  { %1084 = vsyncpa [#allocation4 + $0x1], 1 }

</bundles_post_ra>
